<compile_context>
chip_gen: v6e
topology: v6e:2x2x1
jax: 0.10.0
libtpu: 0.0.40
codegen_flags: <defaults>
</compile_context>

<pallas_src>
import numpy as np
import jax
import jax.numpy as jnp
from jax.experimental import pallas as pl
from jax.experimental.pallas import tpu as pltpu

# ----------------------------- synthetic config ------------------------------
INPUT_DIM = 14          # config.model.input_dim   (Kalah board: 14 pits)
EMBED_DIM = 32          # config.model.embedding_dim (== conv spatial length E)
NUM_FILTERS = 32        # config.model.num_filters (F)
NUM_RES_BLOCKS = 2      # config.model.num_residual_blocks
KERNEL_SIZES = (3, 5)   # config.model.kernel_sizes (alternating)
POLICY_DIM = 6          # config.model.policy_output_dim
VALUE_HIDDEN = 32       # config.model.value_head_hidden_dim
BN_EPS = 1e-5
BATCH = 2

BLOCK_KS = tuple(KERNEL_SIZES[i % len(KERNEL_SIZES)] for i in range(NUM_RES_BLOCKS))
KMAX = max((3,) + BLOCK_KS)            # widest conv kernel in the net
PADB = 8                               # sublane-aligned left halo in the conv scratch
PADROWS = PADB + EMBED_DIM + 8         # halo | live window | halo
NARROW_W = 128                         # lane width of the 128-lane parameter slab
WIDE_W = 256                           # lane width of the fc1 parameter slab
OUT_W = 128                            # lane-dense packed output width

assert KMAX // 2 <= PADB and KMAX // 2 <= 8, "conv halo too narrow"


def _round8(n):
    return (n + 7) // 8 * 8


# --------------------------- wrapper-side packing ------------------------------
def pack_params(P):
    """Fold BN into conv weights/biases and pack everything into 3 lane-dense slabs:
       conv_slab  (rows, F)         residual-block im2col tap matrices
       narrow     (rows, 128)       fc2 / emb / fused heads / ic taps / all bias rows
       wide       (rows, 256)       fc1 weight + bias
    """
    E, F = EMBED_DIM, NUM_FILTERS

    def fold_bn(w, b, bn):
        g, beta, mean, var = bn
        s = g / jnp.sqrt(var + BN_EPS)                       # (F,)
        return w * s[:, None, None], (b - mean) * s + beta

    # ---- conv-weight slab: stacked im2col tap matrices (residual blocks only) ----
    conv_rows, conv_offs = [], {}

    def add_conv(name, w_stacked):
        conv_offs[name] = sum(r.shape[0] for r in conv_rows)
        conv_rows.append(w_stacked.astype(jnp.float32))

    conv_biases = {}
    block_ks = []
    for j, blk in enumerate(P['blocks']):
        k = blk['w1'].shape[-1]
        block_ks.append(k)
        w1, b1 = fold_bn(blk['w1'], blk['b1'], blk['bn1'])
        w2, b2 = fold_bn(blk['w2'], blk['b2'], blk['bn2'])
        # W_stack[t*F + c_in, c_out] = w[c_out, c_in, t]
        add_conv(f'b{j}c1', jnp.transpose(w1, (2, 1, 0)).reshape(k * F, F))
        add_conv(f'b{j}c2', jnp.transpose(w2, (2, 1, 0)).reshape(k * F, F))
        conv_biases[f'b{j}c1'] = b1
        conv_biases[f'b{j}c2'] = b2
    conv_slab = jnp.concatenate(conv_rows, axis=0)

    # ---- narrow (128-lane) slab: 8-row aligned entries ----
    nrows, noffs = [], {}

    def add_n(name, a2d):
        a2d = jnp.asarray(a2d, jnp.float32)
        r, c = a2d.shape
        noffs[name] = sum(x.shape[0] for x in nrows)
        nrows.append(jnp.pad(a2d, ((0, _round8(r) - r), (0, NARROW_W - c))))

    # initial conv: in_channels=1 -> dedicated (3, F) tap matrix, BN folded
    w0, b0 = fold_bn(P['ic_w'], P['ic_b'], P['ic_bn'])       # (F,1,3), (F,)
    add_n('ic_w', jnp.transpose(w0[:, 0, :], (1, 0)))        # (3, F): [t, c_out]

    emb_w_aug = jnp.concatenate([P['emb_w'], P['emb_b'][:, None]], axis=1)   # (E, 15)
    add_n('emb_w', emb_w_aug)
    add_n('fc2_w', P['fc2_w'].T)                             # (256, 128)
    # fused heads: [policy | value-hidden] side-by-side along lanes
    add_n('heads_w', jnp.concatenate([P['pol_w'].T, P['v1_w'].T], axis=1))   # (128, 38)
    add_n('heads_b', jnp.concatenate([P['pol_b'], P['v1_b']])[None, :])      # (1, 38)
    add_n('fc2_b', P['fc2_b'][None, :])
    add_n('v2', jnp.concatenate([P['v2_w'], P['v2_b'][None, :]], axis=1))    # (1, 33)
    add_n('bias_ic', b0[None, :])
    for name, b in conv_biases.items():
        add_n('bias_' + name, b[None, :])
    narrow_slab = jnp.concatenate(nrows, axis=0)

    # ---- wide (256-lane) slab: fc1 only ----
    wrows, woffs = [], {}

    def add_w(name, a2d):
        a2d = jnp.asarray(a2d, jnp.float32)
        r, c = a2d.shape
        woffs[name] = sum(x.shape[0] for x in wrows)
        wrows.append(jnp.pad(a2d, ((0, _round8(r) - r), (0, WIDE_W - c))))

    add_w('fc1_w', P['fc1_w'].T)        # (2F, 256)
    add_w('fc1_b', P['fc1_b'][None, :])
    wide_slab = jnp.concatenate(wrows, axis=0)

    meta = dict(conv_offs=conv_offs, noffs=noffs, woffs=woffs, block_ks=tuple(block_ks))
    return conv_slab, narrow_slab, wide_slab, meta


# ---------------------------------- kernel ------------------------------------
def make_kernel(B, meta):
    E, F, Pd, Vh = EMBED_DIM, NUM_FILTERS, POLICY_DIM, VALUE_HIDDEN
    BE = B * E
    co, no, wo = meta['conv_offs'], meta['noffs'], meta['woffs']
    block_ks = meta['block_ks']

    def kernel(xT_ref, cw_ref, pw_ref, pww_ref, out_ref, apad_ref):
        # Zero the padded conv scratch ONCE: the halo rows provide the conv zero
        # padding and are never written again; only the live window [PADB, PADB+E)
        # is rewritten per conv.
        apad_ref[...] = jnp.zeros((B, PADROWS, F), jnp.float32)

        def nrow(name, width):                    # one packed bias/vector row
            return pw_ref[no[name]:no[name] + 1, 0:width]

        def nmat(name, rows, cols):               # one packed weight matrix
            return pw_ref[no[name]:no[name] + rows, 0:cols]

        def conv_from_pad(k, name):
            """im2col conv (+ BN-folded bias); input already in the apad live window.
            The im2col matrix is built as an in-register value (no VMEM staging)."""
            p = k // 2
            col = jnp.concatenate(
                [apad_ref[:, PADB - p + t: PADB - p + t + E, :].reshape(BE, F)
                 for t in range(k)], axis=1)                              # (BE, kF)
            w = cw_ref[co[name]:co[name] + k * F, :]                      # (kF, F)
            return (jnp.dot(col, w, preferred_element_type=jnp.float32)
                    + nrow('bias_' + name, F))

        def conv(a, k, name):
            apad_ref[:, PADB:PADB + E, :] = a.reshape(B, E, F)
            return conv_from_pad(k, name)

        # ---- embedding: relu(W_aug @ [x^T; 1]) -> (E, B), spatial on sublanes ----
        embT = jnp.maximum(
            jnp.dot(nmat('emb_w', E, INPUT_DIM + 1), xT_ref[...],
                    preferred_element_type=jnp.float32), 0.0)             # (E, B)

        # ---- initial conv (in_channels=1, BN folded) as a dedicated (BE,3)@(3,F)
        # matmul.  The embedding is written into lane 0 of the still-all-zero live
        # window so the shifted taps pick up zero padding from the halos.
        # INVARIANT: lanes 1..F-1 of apad are untouched between the one-time clear
        # above and the first residual conv (which overwrites the full window).
        for b in range(B):
            apad_ref[b, PADB:PADB + E, 0:1] = embT[:, b:b + 1]
        col_ic = jnp.concatenate(
            [apad_ref[:, PADB - 1 + t: PADB - 1 + t + E, 0:1].reshape(BE, 1)
             for t in range(3)], axis=1)                                  # (BE, 3)
        a = jnp.maximum(
            jnp.dot(col_ic, nmat('ic_w', 3, F), preferred_element_type=jnp.float32)
            + nrow('bias_ic', F), 0.0)                                    # (BE, F)

        # ---- residual blocks (whole batch at once) ----
        for j, k in enumerate(block_ks):
            resid = a
            a = jnp.maximum(conv(a, k, f'b{j}c1'), 0.0)
            a = conv(a, k, f'b{j}c2')
            a = jnp.maximum(a + resid, 0.0)

        # ---- global max / avg pool over the spatial axis, concat [max | avg] ----
        a3 = a.reshape(B, E, F)
        pooled = jnp.concatenate(
            [jnp.max(a3, axis=1), jnp.sum(a3, axis=1) * (1.0 / E)], axis=1)  # (B, 2F)

        # ---- fully connected trunk (whole batch) ----
        h = jnp.maximum(
            jnp.dot(pooled, pww_ref[wo['fc1_w']:wo['fc1_w'] + 2 * F, :],
                    preferred_element_type=jnp.float32)
            + pww_ref[wo['fc1_b']:wo['fc1_b'] + 1, :], 0.0)               # (B, 256)
        h = jnp.maximum(
            jnp.dot(h, nmat('fc2_w', 256, 128), preferred_element_type=jnp.float32)
            + nrow('fc2_b', 128), 0.0)                                    # (B, 128)

        # ---- fused heads: ONE (B,128)@(128, Pd+Vh) matmul, then split ----
        hv = jnp.dot(h, nmat('heads_w', 128, Pd + Vh),
                     preferred_element_type=jnp.float32) + nrow('heads_b', Pd + Vh)
        logits = hv[:, 0:Pd]
        z = logits - jnp.max(logits, axis=1, keepdims=True)
        logp = z - jnp.log(jnp.sum(jnp.exp(z), axis=1, keepdims=True))

        vh = jnp.maximum(hv[:, Pd:Pd + Vh], 0.0)
        v2 = nrow('v2', Vh + 1)                                           # [w | b]
        val = jnp.tanh(jnp.sum(vh * v2[:, 0:Vh], axis=1, keepdims=True)
                       + v2[:, Vh:Vh + 1])

        # single lane-dense packed output store: [log_policy | value | zeros]
        out_ref[...] = jnp.concatenate(
            [logp, val, jnp.zeros((B, OUT_W - Pd - 1), jnp.float32)], axis=1)

    return kernel


# ------------------------------- Pallas wrapper --------------------------------
def kalah_forward_pallas(x, conv_slab, narrow_slab, wide_slab, meta):
    """x: (B, INPUT_DIM) f32.  Returns (log_policy (B,6), value (B,1))."""
    B = x.shape[0]
    E, F = EMBED_DIM, NUM_FILTERS
    x = x.astype(jnp.float32)
    # augmented x^T with a ones row so the embedding bias folds into the matmul
    xT_aug = jnp.concatenate([x.T, jnp.ones((1, B), jnp.float32)], axis=0)   # (15, B)

    # advisory cost estimate (kernel is launch/DMA bound; helps XLA overlap)
    flops = 2 * B * E * (INPUT_DIM + 1)                      # embedding
    flops += 2 * B * E * 3 * F                               # initial conv
    for k in meta['block_ks']:
        flops += 2 * 2 * B * E * (k * F) * F                 # two convs per block
    flops += 2 * B * (2 * F) * 256 + 2 * B * 256 * 128       # fc trunk
    flops += 2 * B * 128 * (POLICY_DIM + VALUE_HIDDEN) + 2 * B * VALUE_HIDDEN
    bytes_accessed = 4 * (xT_aug.size + conv_slab.size + narrow_slab.size
                          + wide_slab.size + B * OUT_W)

    kernel = make_kernel(B, meta)
    out = pl.pallas_call(
        kernel,
        out_shape=jax.ShapeDtypeStruct((B, OUT_W), jnp.float32),
        in_specs=[pl.BlockSpec(memory_space=pltpu.MemorySpace.VMEM)] * 4,
        out_specs=pl.BlockSpec(memory_space=pltpu.MemorySpace.VMEM),
        scratch_shapes=[
            pltpu.VMEM((B, PADROWS, NUM_FILTERS), jnp.float32),   # padded activation
        ],
        cost_estimate=pl.CostEstimate(flops=flops, transcendentals=B * (POLICY_DIM + 3),
                                      bytes_accessed=bytes_accessed),
    )(xT_aug, conv_slab, narrow_slab, wide_slab)

    log_policy = out[:, :POLICY_DIM]
    value = out[:, POLICY_DIM:POLICY_DIM + 1]
    return log_policy, value


# ------------------------ deterministic parameter init ------------------------
def he_normal(key, shape, fan_out):
    return jax.random.normal(key, shape, jnp.float32) * np.sqrt(2.0 / fan_out)


def init_params(key):
    E, F, Vh, Pd = EMBED_DIM, NUM_FILTERS, VALUE_HIDDEN, POLICY_DIM
    keys = iter(jax.random.split(key, 96))

    # randomized BN stats so the wrapper-side BN folding is actually validated
    def bn_rand():
        g = jax.random.uniform(next(keys), (F,), jnp.float32, 0.5, 1.5)
        be = jax.random.normal(next(keys), (F,), jnp.float32) * 0.1
        mu = jax.random.normal(next(keys), (F,), jnp.float32) * 0.1
        var = jax.random.uniform(next(keys), (F,), jnp.float32, 0.5, 1.5)
        return (g, be, mu, var)

    P = {
        'emb_w': he_normal(next(keys), (E, INPUT_DIM), E),
        'emb_b': jax.random.normal(next(keys), (E,), jnp.float32) * 0.05,
        'ic_w': he_normal(next(keys), (F, 1, 3), F * 3),
        'ic_b': jax.random.normal(next(keys), (F,), jnp.float32) * 0.05,
        'ic_bn': bn_rand(),
        'blocks': [],
        'fc1_w': he_normal(next(keys), (256, 2 * F), 256),
        'fc1_b': jax.random.normal(next(keys), (256,), jnp.float32) * 0.05,
        'fc2_w': he_normal(next(keys), (128, 256), 128),
        'fc2_b': jax.random.normal(next(keys), (128,), jnp.float32) * 0.05,
        'pol_w': he_normal(next(keys), (Pd, 128), Pd),
        'pol_b': jax.random.normal(next(keys), (Pd,), jnp.float32) * 0.05,
        'v1_w': he_normal(next(keys), (Vh, 128), Vh),
        'v1_b': jax.random.normal(next(keys), (Vh,), jnp.float32) * 0.05,
        'v2_w': he_normal(next(keys), (1, Vh), 1),
        'v2_b': jnp.zeros((1,), jnp.float32),
    }
    for k in BLOCK_KS:
        P['blocks'].append({
            'w1': he_normal(next(keys), (F, F, k), F * k),
            'b1': jax.random.normal(next(keys), (F,), jnp.float32) * 0.05,
            'bn1': bn_rand(),
            'w2': he_normal(next(keys), (F, F, k), F * k),
            'b2': jax.random.normal(next(keys), (F,), jnp.float32) * 0.05,
            'bn2': bn_rand(),
        })
    return P


# ------------------------------ pure-JAX reference ----------------------------
def ref_forward(x, P):
    hp = jax.lax.Precision.HIGHEST

    def conv1d(a, w, b, pad):
        out = jax.lax.conv_general_dilated(
            a, w, window_strides=(1,), padding=[(pad, pad)],
            dimension_numbers=('NCH', 'OIH', 'NCH'), precision=hp)
        return out + b[None, :, None]

    def bn(a, stats):
        g, be, mu, var = stats
        return (a - mu[None, :, None]) / jnp.sqrt(var[None, :, None] + BN_EPS) \
            * g[None, :, None] + be[None, :, None]

    h = jnp.maximum(jnp.dot(x, P['emb_w'].T, precision=hp) + P['emb_b'], 0.0)
    a = h[:, None, :]                                       # NCL: (B, 1, E)
    a = jnp.maximum(bn(conv1d(a, P['ic_w'], P['ic_b'], 1), P['ic_bn']), 0.0)
    for blk in P['blocks']:
        res = a
        k = blk['w1'].shape[-1]
        pad = k // 2
        a = jnp.maximum(bn(conv1d(a, blk['w1'], blk['b1'], pad), blk['bn1']), 0.0)
        a = bn(conv1d(a, blk['w2'], blk['b2'], pad), blk['bn2'])
        a = jnp.maximum(a + res, 0.0)
    feat = jnp.concatenate([jnp.max(a, axis=2), jnp.mean(a, axis=2)], axis=1)
    h = jnp.maximum(jnp.dot(feat, P['fc1_w'].T, precision=hp) + P['fc1_b'], 0.0)
    h = jnp.maximum(jnp.dot(h, P['fc2_w'].T, precision=hp) + P['fc2_b'], 0.0)
    logits = jnp.dot(h, P['pol_w'].T, precision=hp) + P['pol_b']
    logp = jax.nn.log_softmax(logits, axis=1)
    vh = jnp.maximum(jnp.dot(h, P['v1_w'].T, precision=hp) + P['v1_b'], 0.0)
    val = jnp.tanh(jnp.dot(vh, P['v2_w'].T, precision=hp) + P['v2_b'])
    return logp, val


# ----------------------------------- main -------------------------------------
if __name__ == "__main__":
    key = jax.random.PRNGKey(0)
    kp, kx = jax.random.split(key)
    params = init_params(kp)
    x = jax.random.uniform(kx, (BATCH, INPUT_DIM), jnp.float32, 0.0, 6.0)  # board state [B, 14]

    conv_slab, narrow_slab, wide_slab, meta = pack_params(params)   # one-time packing + BN fold
    log_policy, value = kalah_forward_pallas(x, conv_slab, narrow_slab, wide_slab, meta)
    jax.block_until_ready((log_policy, value))

    ref_logp, ref_val = ref_forward(x, params)
    np.testing.assert_allclose(np.asarray(log_policy), np.asarray(ref_logp), rtol=1e-2, atol=1e-2)
    np.testing.assert_allclose(np.asarray(value), np.asarray(ref_val), rtol=1e-2, atol=1e-2)
    assert log_policy.shape == (BATCH, POLICY_DIM) and value.shape == (BATCH, 1)

    print("KERNEL_OK")
</pallas_src>

<mosaic_0001>
module attributes {stable_mosaic.version = 11 : i64} {
  func.func @kernel(%arg0: memref<15x2xf32, #tpu.memory_space<vmem>>, %arg1: memref<512x32xf32, #tpu.memory_space<vmem>>, %arg2: memref<488x128xf32, #tpu.memory_space<vmem>>, %arg3: memref<72x256xf32, #tpu.memory_space<vmem>>, %arg4: memref<2x128xf32, #tpu.memory_space<vmem>>, %arg5: memref<2x48x32xf32, #tpu.memory_space<vmem>>) attributes {dimension_semantics = [], scalar_prefetch = 0 : i64, scratch_operands = 1 : i64, tpu.core_type = #tpu.core_type<tc>} {
    %cst = arith.constant 0.000000e+00 : f32
    %0 = vector.broadcast %cst : f32 to vector<2x48x32xf32>
    %c0 = arith.constant 0 : index
    %c0_0 = arith.constant 0 : index
    %c0_1 = arith.constant 0 : index
    %1 = vector.load %arg5[%c0, %c0_0, %c0_1] : memref<2x48x32xf32, #tpu.memory_space<vmem>>, vector<2x48x32xf32>
    tpu.vector_store %arg5[%c0, %c0_0, %c0_1], %0 {strides = array<i32>} : memref<2x48x32xf32, #tpu.memory_space<vmem>>, vector<2x48x32xf32>,
    %c8 = arith.constant 8 : index
    %c0_2 = arith.constant 0 : index
    %2 = vector.load %arg2[%c8, %c0_2] : memref<488x128xf32, #tpu.memory_space<vmem>>, vector<32x15xf32>
    %c0_3 = arith.constant 0 : index
    %c0_4 = arith.constant 0 : index
    %3 = vector.load %arg0[%c0_3, %c0_4] : memref<15x2xf32, #tpu.memory_space<vmem>>, vector<15x2xf32>
    %cst_5 = arith.constant dense<0.000000e+00> : vector<32x2xf32>
    %4 = tpu.matmul %2, %3, %cst_5 {dimension_numbers = #tpu.dot_dimension_numbers<[1], [0], [0], [1], [0, 0, 1, 1], [], []>} : vector<32x15xf32>, vector<15x2xf32>, vector<32x2xf32> -> vector<32x2xf32>
    %cst_6 = arith.constant 0.000000e+00 : f32
    %5 = vector.broadcast %cst_6 : f32 to vector<32x2xf32>
    %6 = arith.maximumf %4, %5 : vector<32x2xf32>
    %7 = vector.extract_strided_slice %6 {offsets = [0, 0], sizes = [32, 1], strides = [1, 1]} : vector<32x2xf32> to vector<32x1xf32>
    %c0_7 = arith.constant 0 : index
    %c8_8 = arith.constant 8 : index
    %c0_9 = arith.constant 0 : index
    %8 = vector.load %arg5[%c0_7, %c8_8, %c0_9] : memref<2x48x32xf32, #tpu.memory_space<vmem>>, vector<1x32x1xf32>
    %9 = vector.shape_cast %8 : vector<1x32x1xf32> to vector<32x1xf32>
    %10 = vector.shape_cast %7 : vector<32x1xf32> to vector<1x32x1xf32>
    tpu.vector_store %arg5[%c0_7, %c8_8, %c0_9], %10 {strides = array<i32>} : memref<2x48x32xf32, #tpu.memory_space<vmem>>, vector<1x32x1xf32>,
    %11 = vector.extract_strided_slice %6 {offsets = [0, 1], sizes = [32, 1], strides = [1, 1]} : vector<32x2xf32> to vector<32x1xf32>
    %c1 = arith.constant 1 : index
    %c8_10 = arith.constant 8 : index
    %c0_11 = arith.constant 0 : index
    %12 = vector.load %arg5[%c1, %c8_10, %c0_11] : memref<2x48x32xf32, #tpu.memory_space<vmem>>, vector<1x32x1xf32>
    %13 = vector.shape_cast %12 : vector<1x32x1xf32> to vector<32x1xf32>
    %14 = vector.shape_cast %11 : vector<32x1xf32> to vector<1x32x1xf32>
    tpu.vector_store %arg5[%c1, %c8_10, %c0_11], %14 {strides = array<i32>} : memref<2x48x32xf32, #tpu.memory_space<vmem>>, vector<1x32x1xf32>,
    %c0_12 = arith.constant 0 : index
    %c7 = arith.constant 7 : index
    %c0_13 = arith.constant 0 : index
    %15 = vector.load %arg5[%c0_12, %c7, %c0_13] : memref<2x48x32xf32, #tpu.memory_space<vmem>>, vector<2x32x1xf32>
    %16 = vector.shape_cast %15 : vector<2x32x1xf32> to vector<64x1xf32>
    %c0_14 = arith.constant 0 : index
    %c8_15 = arith.constant 8 : index
    %c0_16 = arith.constant 0 : index
    %17 = vector.load %arg5[%c0_14, %c8_15, %c0_16] : memref<2x48x32xf32, #tpu.memory_space<vmem>>, vector<2x32x1xf32>
    %18 = vector.shape_cast %17 : vector<2x32x1xf32> to vector<64x1xf32>
    %c0_17 = arith.constant 0 : index
    %c9 = arith.constant 9 : index
    %c0_18 = arith.constant 0 : index
    %19 = vector.load %arg5[%c0_17, %c9, %c0_18] : memref<2x48x32xf32, #tpu.memory_space<vmem>>, vector<2x32x1xf32>
    %20 = vector.shape_cast %19 : vector<2x32x1xf32> to vector<64x1xf32>
    %21 = tpu.concatenate %16, %18, %20 in 1 : vector<64x1xf32>, vector<64x1xf32>, vector<64x1xf32> -> vector<64x3xf32>
    %c0_19 = arith.constant 0 : index
    %c0_20 = arith.constant 0 : index
    %22 = vector.load %arg2[%c0_19, %c0_20] : memref<488x128xf32, #tpu.memory_space<vmem>>, vector<3x32xf32>
    %cst_21 = arith.constant dense<0.000000e+00> : vector<64x32xf32>
    %23 = tpu.matmul %21, %22, %cst_21 {dimension_numbers = #tpu.dot_dimension_numbers<[1], [0], [0], [1], [0, 0, 1, 1], [], []>} : vector<64x3xf32>, vector<3x32xf32>, vector<64x32xf32> -> vector<64x32xf32>
    %c448 = arith.constant 448 : index
    %c0_22 = arith.constant 0 : index
    %24 = vector.load %arg2[%c448, %c0_22] : memref<488x128xf32, #tpu.memory_space<vmem>>, vector<1x32xf32>
    %25 = vector.broadcast %24 : vector<1x32xf32> to vector<64x32xf32>
    %26 = arith.addf %23, %25 : vector<64x32xf32>
    %cst_23 = arith.constant 0.000000e+00 : f32
    %27 = vector.broadcast %cst_23 : f32 to vector<64x32xf32>
    %28 = arith.maximumf %26, %27 : vector<64x32xf32>
    %29 = vector.shape_cast %28 : vector<64x32xf32> to vector<2x32x32xf32>
    %c0_24 = arith.constant 0 : index
    %c8_25 = arith.constant 8 : index
    %c0_26 = arith.constant 0 : index
    %30 = vector.load %arg5[%c0_24, %c8_25, %c0_26] : memref<2x48x32xf32, #tpu.memory_space<vmem>>, vector<2x32x32xf32>
    tpu.vector_store %arg5[%c0_24, %c8_25, %c0_26], %29 {strides = array<i32>} : memref<2x48x32xf32, #tpu.memory_space<vmem>>, vector<2x32x32xf32>,
    %c0_27 = arith.constant 0 : index
    %c7_28 = arith.constant 7 : index
    %c0_29 = arith.constant 0 : index
    %31 = vector.load %arg5[%c0_27, %c7_28, %c0_29] : memref<2x48x32xf32, #tpu.memory_space<vmem>>, vector<2x32x32xf32>
    %32 = vector.shape_cast %31 : vector<2x32x32xf32> to vector<64x32xf32>
    %c0_30 = arith.constant 0 : index
    %c8_31 = arith.constant 8 : index
    %c0_32 = arith.constant 0 : index
    %33 = vector.load %arg5[%c0_30, %c8_31, %c0_32] : memref<2x48x32xf32, #tpu.memory_space<vmem>>, vector<2x32x32xf32>
    %34 = vector.shape_cast %33 : vector<2x32x32xf32> to vector<64x32xf32>
    %c0_33 = arith.constant 0 : index
    %c9_34 = arith.constant 9 : index
    %c0_35 = arith.constant 0 : index
    %35 = vector.load %arg5[%c0_33, %c9_34, %c0_35] : memref<2x48x32xf32, #tpu.memory_space<vmem>>, vector<2x32x32xf32>
    %36 = vector.shape_cast %35 : vector<2x32x32xf32> to vector<64x32xf32>
    %37 = tpu.concatenate %32, %34, %36 in 1 : vector<64x32xf32>, vector<64x32xf32>, vector<64x32xf32> -> vector<64x96xf32>
    %c0_36 = arith.constant 0 : index
    %c0_37 = arith.constant 0 : index
    %38 = vector.load %arg1[%c0_36, %c0_37] : memref<512x32xf32, #tpu.memory_space<vmem>>, vector<96x32xf32>
    %cst_38 = arith.constant dense<0.000000e+00> : vector<64x32xf32>
    %39 = tpu.matmul %37, %38, %cst_38 {dimension_numbers = #tpu.dot_dimension_numbers<[1], [0], [0], [1], [0, 0, 1, 1], [], []>} : vector<64x96xf32>, vector<96x32xf32>, vector<64x32xf32> -> vector<64x32xf32>
    %c456 = arith.constant 456 : index
    %c0_39 = arith.constant 0 : index
    %40 = vector.load %arg2[%c456, %c0_39] : memref<488x128xf32, #tpu.memory_space<vmem>>, vector<1x32xf32>
    %41 = vector.broadcast %40 : vector<1x32xf32> to vector<64x32xf32>
    %42 = arith.addf %39, %41 : vector<64x32xf32>
    %cst_40 = arith.constant 0.000000e+00 : f32
    %43 = vector.broadcast %cst_40 : f32 to vector<64x32xf32>
    %44 = arith.maximumf %42, %43 : vector<64x32xf32>
    %45 = vector.shape_cast %44 : vector<64x32xf32> to vector<2x32x32xf32>
    %c0_41 = arith.constant 0 : index
    %c8_42 = arith.constant 8 : index
    %c0_43 = arith.constant 0 : index
    %46 = vector.load %arg5[%c0_41, %c8_42, %c0_43] : memref<2x48x32xf32, #tpu.memory_space<vmem>>, vector<2x32x32xf32>
    tpu.vector_store %arg5[%c0_41, %c8_42, %c0_43], %45 {strides = array<i32>} : memref<2x48x32xf32, #tpu.memory_space<vmem>>, vector<2x32x32xf32>,
    %c0_44 = arith.constant 0 : index
    %c7_45 = arith.constant 7 : index
    %c0_46 = arith.constant 0 : index
    %47 = vector.load %arg5[%c0_44, %c7_45, %c0_46] : memref<2x48x32xf32, #tpu.memory_space<vmem>>, vector<2x32x32xf32>
    %48 = vector.shape_cast %47 : vector<2x32x32xf32> to vector<64x32xf32>
    %c0_47 = arith.constant 0 : index
    %c8_48 = arith.constant 8 : index
    %c0_49 = arith.constant 0 : index
    %49 = vector.load %arg5[%c0_47, %c8_48, %c0_49] : memref<2x48x32xf32, #tpu.memory_space<vmem>>, vector<2x32x32xf32>
    %50 = vector.shape_cast %49 : vector<2x32x32xf32> to vector<64x32xf32>
    %c0_50 = arith.constant 0 : index
    %c9_51 = arith.constant 9 : index
    %c0_52 = arith.constant 0 : index
    %51 = vector.load %arg5[%c0_50, %c9_51, %c0_52] : memref<2x48x32xf32, #tpu.memory_space<vmem>>, vector<2x32x32xf32>
    %52 = vector.shape_cast %51 : vector<2x32x32xf32> to vector<64x32xf32>
    %53 = tpu.concatenate %48, %50, %52 in 1 : vector<64x32xf32>, vector<64x32xf32>, vector<64x32xf32> -> vector<64x96xf32>
    %c96 = arith.constant 96 : index
    %c0_53 = arith.constant 0 : index
    %54 = vector.load %arg1[%c96, %c0_53] : memref<512x32xf32, #tpu.memory_space<vmem>>, vector<96x32xf32>
    %cst_54 = arith.constant dense<0.000000e+00> : vector<64x32xf32>
    %55 = tpu.matmul %53, %54, %cst_54 {dimension_numbers = #tpu.dot_dimension_numbers<[1], [0], [0], [1], [0, 0, 1, 1], [], []>} : vector<64x96xf32>, vector<96x32xf32>, vector<64x32xf32> -> vector<64x32xf32>
    %c464 = arith.constant 464 : index
    %c0_55 = arith.constant 0 : index
    %56 = vector.load %arg2[%c464, %c0_55] : memref<488x128xf32, #tpu.memory_space<vmem>>, vector<1x32xf32>
    %57 = vector.broadcast %56 : vector<1x32xf32> to vector<64x32xf32>
    %58 = arith.addf %55, %57 : vector<64x32xf32>
    %59 = arith.addf %58, %28 : vector<64x32xf32>
    %cst_56 = arith.constant 0.000000e+00 : f32
    %60 = vector.broadcast %cst_56 : f32 to vector<64x32xf32>
    %61 = arith.maximumf %59, %60 : vector<64x32xf32>
    %62 = vector.shape_cast %61 : vector<64x32xf32> to vector<2x32x32xf32>
    %c0_57 = arith.constant 0 : index
    %c8_58 = arith.constant 8 : index
    %c0_59 = arith.constant 0 : index
    %63 = vector.load %arg5[%c0_57, %c8_58, %c0_59] : memref<2x48x32xf32, #tpu.memory_space<vmem>>, vector<2x32x32xf32>
    tpu.vector_store %arg5[%c0_57, %c8_58, %c0_59], %62 {strides = array<i32>} : memref<2x48x32xf32, #tpu.memory_space<vmem>>, vector<2x32x32xf32>,
    %c0_60 = arith.constant 0 : index
    %c6 = arith.constant 6 : index
    %c0_61 = arith.constant 0 : index
    %64 = vector.load %arg5[%c0_60, %c6, %c0_61] : memref<2x48x32xf32, #tpu.memory_space<vmem>>, vector<2x32x32xf32>
    %65 = vector.shape_cast %64 : vector<2x32x32xf32> to vector<64x32xf32>
    %c0_62 = arith.constant 0 : index
    %c7_63 = arith.constant 7 : index
    %c0_64 = arith.constant 0 : index
    %66 = vector.load %arg5[%c0_62, %c7_63, %c0_64] : memref<2x48x32xf32, #tpu.memory_space<vmem>>, vector<2x32x32xf32>
    %67 = vector.shape_cast %66 : vector<2x32x32xf32> to vector<64x32xf32>
    %c0_65 = arith.constant 0 : index
    %c8_66 = arith.constant 8 : index
    %c0_67 = arith.constant 0 : index
    %68 = vector.load %arg5[%c0_65, %c8_66, %c0_67] : memref<2x48x32xf32, #tpu.memory_space<vmem>>, vector<2x32x32xf32>
    %69 = vector.shape_cast %68 : vector<2x32x32xf32> to vector<64x32xf32>
    %c0_68 = arith.constant 0 : index
    %c9_69 = arith.constant 9 : index
    %c0_70 = arith.constant 0 : index
    %70 = vector.load %arg5[%c0_68, %c9_69, %c0_70] : memref<2x48x32xf32, #tpu.memory_space<vmem>>, vector<2x32x32xf32>
    %71 = vector.shape_cast %70 : vector<2x32x32xf32> to vector<64x32xf32>
    %c0_71 = arith.constant 0 : index
    %c10 = arith.constant 10 : index
    %c0_72 = arith.constant 0 : index
    %72 = vector.load %arg5[%c0_71, %c10, %c0_72] : memref<2x48x32xf32, #tpu.memory_space<vmem>>, vector<2x32x32xf32>
    %73 = vector.shape_cast %72 : vector<2x32x32xf32> to vector<64x32xf32>
    %74 = tpu.concatenate %65, %67, %69, %71, %73 in 1 : vector<64x32xf32>, vector<64x32xf32>, vector<64x32xf32>, vector<64x32xf32>, vector<64x32xf32> -> vector<64x160xf32>
    %c192 = arith.constant 192 : index
    %c0_73 = arith.constant 0 : index
    %75 = vector.load %arg1[%c192, %c0_73] : memref<512x32xf32, #tpu.memory_space<vmem>>, vector<160x32xf32>
    %cst_74 = arith.constant dense<0.000000e+00> : vector<64x32xf32>
    %76 = tpu.matmul %74, %75, %cst_74 {dimension_numbers = #tpu.dot_dimension_numbers<[1], [0], [0], [1], [0, 0, 1, 1], [], []>} : vector<64x160xf32>, vector<160x32xf32>, vector<64x32xf32> -> vector<64x32xf32>
    %c472 = arith.constant 472 : index
    %c0_75 = arith.constant 0 : index
    %77 = vector.load %arg2[%c472, %c0_75] : memref<488x128xf32, #tpu.memory_space<vmem>>, vector<1x32xf32>
    %78 = vector.broadcast %77 : vector<1x32xf32> to vector<64x32xf32>
    %79 = arith.addf %76, %78 : vector<64x32xf32>
    %cst_76 = arith.constant 0.000000e+00 : f32
    %80 = vector.broadcast %cst_76 : f32 to vector<64x32xf32>
    %81 = arith.maximumf %79, %80 : vector<64x32xf32>
    %82 = vector.shape_cast %81 : vector<64x32xf32> to vector<2x32x32xf32>
    %c0_77 = arith.constant 0 : index
    %c8_78 = arith.constant 8 : index
    %c0_79 = arith.constant 0 : index
    %83 = vector.load %arg5[%c0_77, %c8_78, %c0_79] : memref<2x48x32xf32, #tpu.memory_space<vmem>>, vector<2x32x32xf32>
    tpu.vector_store %arg5[%c0_77, %c8_78, %c0_79], %82 {strides = array<i32>} : memref<2x48x32xf32, #tpu.memory_space<vmem>>, vector<2x32x32xf32>,
    %c0_80 = arith.constant 0 : index
    %c6_81 = arith.constant 6 : index
    %c0_82 = arith.constant 0 : index
    %84 = vector.load %arg5[%c0_80, %c6_81, %c0_82] : memref<2x48x32xf32, #tpu.memory_space<vmem>>, vector<2x32x32xf32>
    %85 = vector.shape_cast %84 : vector<2x32x32xf32> to vector<64x32xf32>
    %c0_83 = arith.constant 0 : index
    %c7_84 = arith.constant 7 : index
    %c0_85 = arith.constant 0 : index
    %86 = vector.load %arg5[%c0_83, %c7_84, %c0_85] : memref<2x48x32xf32, #tpu.memory_space<vmem>>, vector<2x32x32xf32>
    %87 = vector.shape_cast %86 : vector<2x32x32xf32> to vector<64x32xf32>
    %c0_86 = arith.constant 0 : index
    %c8_87 = arith.constant 8 : index
    %c0_88 = arith.constant 0 : index
    %88 = vector.load %arg5[%c0_86, %c8_87, %c0_88] : memref<2x48x32xf32, #tpu.memory_space<vmem>>, vector<2x32x32xf32>
    %89 = vector.shape_cast %88 : vector<2x32x32xf32> to vector<64x32xf32>
    %c0_89 = arith.constant 0 : index
    %c9_90 = arith.constant 9 : index
    %c0_91 = arith.constant 0 : index
    %90 = vector.load %arg5[%c0_89, %c9_90, %c0_91] : memref<2x48x32xf32, #tpu.memory_space<vmem>>, vector<2x32x32xf32>
    %91 = vector.shape_cast %90 : vector<2x32x32xf32> to vector<64x32xf32>
    %c0_92 = arith.constant 0 : index
    %c10_93 = arith.constant 10 : index
    %c0_94 = arith.constant 0 : index
    %92 = vector.load %arg5[%c0_92, %c10_93, %c0_94] : memref<2x48x32xf32, #tpu.memory_space<vmem>>, vector<2x32x32xf32>
    %93 = vector.shape_cast %92 : vector<2x32x32xf32> to vector<64x32xf32>
    %94 = tpu.concatenate %85, %87, %89, %91, %93 in 1 : vector<64x32xf32>, vector<64x32xf32>, vector<64x32xf32>, vector<64x32xf32>, vector<64x32xf32> -> vector<64x160xf32>
    %c352 = arith.constant 352 : index
    %c0_95 = arith.constant 0 : index
    %95 = vector.load %arg1[%c352, %c0_95] : memref<512x32xf32, #tpu.memory_space<vmem>>, vector<160x32xf32>
    %cst_96 = arith.constant dense<0.000000e+00> : vector<64x32xf32>
    %96 = tpu.matmul %94, %95, %cst_96 {dimension_numbers = #tpu.dot_dimension_numbers<[1], [0], [0], [1], [0, 0, 1, 1], [], []>} : vector<64x160xf32>, vector<160x32xf32>, vector<64x32xf32> -> vector<64x32xf32>
    %c480 = arith.constant 480 : index
    %c0_97 = arith.constant 0 : index
    %97 = vector.load %arg2[%c480, %c0_97] : memref<488x128xf32, #tpu.memory_space<vmem>>, vector<1x32xf32>
    %98 = vector.broadcast %97 : vector<1x32xf32> to vector<64x32xf32>
    %99 = arith.addf %96, %98 : vector<64x32xf32>
    %100 = arith.addf %99, %61 : vector<64x32xf32>
    %cst_98 = arith.constant 0.000000e+00 : f32
    %101 = vector.broadcast %cst_98 : f32 to vector<64x32xf32>
    %102 = arith.maximumf %100, %101 : vector<64x32xf32>
    %103 = vector.shape_cast %102 : vector<64x32xf32> to vector<2x32x32xf32>
    %cst_99 = arith.constant dense<0xFF800000> : vector<2x32xf32>
    %104 = vector.multi_reduction <maximumf>, %103, %cst_99 [1] : vector<2x32x32xf32> to vector<2x32xf32>
    %cst_100 = arith.constant dense<0.000000e+00> : vector<2x32xf32>
    %105 = vector.multi_reduction <add>, %103, %cst_100 [1] : vector<2x32x32xf32> to vector<2x32xf32>
    %cst_101 = arith.constant 3.125000e-02 : f32
    %106 = vector.broadcast %cst_101 : f32 to vector<2x32xf32>
    %107 = arith.mulf %105, %106 : vector<2x32xf32>
    %108 = tpu.concatenate %104, %107 in 1 : vector<2x32xf32>, vector<2x32xf32> -> vector<2x64xf32>
    %c0_102 = arith.constant 0 : index
    %c0_103 = arith.constant 0 : index
    %109 = vector.load %arg3[%c0_102, %c0_103] : memref<72x256xf32, #tpu.memory_space<vmem>>, vector<64x256xf32>
    %cst_104 = arith.constant dense<0.000000e+00> : vector<2x256xf32>
    %110 = tpu.matmul %108, %109, %cst_104 {dimension_numbers = #tpu.dot_dimension_numbers<[1], [0], [0], [1], [0, 0, 1, 1], [], []>} : vector<2x64xf32>, vector<64x256xf32>, vector<2x256xf32> -> vector<2x256xf32>
    %c64 = arith.constant 64 : index
    %c0_105 = arith.constant 0 : index
    %111 = vector.load %arg3[%c64, %c0_105] : memref<72x256xf32, #tpu.memory_space<vmem>>, vector<1x256xf32>
    %112 = vector.broadcast %111 : vector<1x256xf32> to vector<2x256xf32>
    %113 = arith.addf %110, %112 : vector<2x256xf32>
    %cst_106 = arith.constant 0.000000e+00 : f32
    %114 = vector.broadcast %cst_106 : f32 to vector<2x256xf32>
    %115 = arith.maximumf %113, %114 : vector<2x256xf32>
    %c40 = arith.constant 40 : index
    %c0_107 = arith.constant 0 : index
    %116 = vector.load %arg2[%c40, %c0_107] : memref<488x128xf32, #tpu.memory_space<vmem>>, vector<256x128xf32>
    %cst_108 = arith.constant dense<0.000000e+00> : vector<2x128xf32>
    %117 = tpu.matmul %115, %116, %cst_108 {dimension_numbers = #tpu.dot_dimension_numbers<[1], [0], [0], [1], [0, 0, 1, 1], [], []>} : vector<2x256xf32>, vector<256x128xf32>, vector<2x128xf32> -> vector<2x128xf32>
    %c432 = arith.constant 432 : index
    %c0_109 = arith.constant 0 : index
    %118 = vector.load %arg2[%c432, %c0_109] : memref<488x128xf32, #tpu.memory_space<vmem>>, vector<1x128xf32>
    %119 = vector.broadcast %118 : vector<1x128xf32> to vector<2x128xf32>
    %120 = arith.addf %117, %119 : vector<2x128xf32>
    %cst_110 = arith.constant 0.000000e+00 : f32
    %121 = vector.broadcast %cst_110 : f32 to vector<2x128xf32>
    %122 = arith.maximumf %120, %121 : vector<2x128xf32>
    %c296 = arith.constant 296 : index
    %c0_111 = arith.constant 0 : index
    %123 = vector.load %arg2[%c296, %c0_111] : memref<488x128xf32, #tpu.memory_space<vmem>>, vector<128x38xf32>
    %cst_112 = arith.constant dense<0.000000e+00> : vector<2x38xf32>
    %124 = tpu.matmul %122, %123, %cst_112 {dimension_numbers = #tpu.dot_dimension_numbers<[1], [0], [0], [1], [0, 0, 1, 1], [], []>} : vector<2x128xf32>, vector<128x38xf32>, vector<2x38xf32> -> vector<2x38xf32>
    %c424 = arith.constant 424 : index
    %c0_113 = arith.constant 0 : index
    %125 = vector.load %arg2[%c424, %c0_113] : memref<488x128xf32, #tpu.memory_space<vmem>>, vector<1x38xf32>
    %126 = vector.broadcast %125 : vector<1x38xf32> to vector<2x38xf32>
    %127 = arith.addf %124, %126 : vector<2x38xf32>
    %128 = vector.extract_strided_slice %127 {offsets = [0, 0], sizes = [2, 6], strides = [1, 1]} : vector<2x38xf32> to vector<2x6xf32>
    %cst_114 = arith.constant dense<0xFF800000> : vector<2xf32>
    %129 = vector.multi_reduction <maximumf>, %128, %cst_114 [1] : vector<2x6xf32> to vector<2xf32>
    %130 = vector.shape_cast %129 : vector<2xf32> to vector<2x1xf32>
    %131 = vector.broadcast %130 : vector<2x1xf32> to vector<2x6xf32>
    %132 = arith.subf %128, %131 : vector<2x6xf32>
    %133 = math.exp %132 : vector<2x6xf32>
    %cst_115 = arith.constant dense<0.000000e+00> : vector<2xf32>
    %134 = vector.multi_reduction <add>, %133, %cst_115 [1] : vector<2x6xf32> to vector<2xf32>
    %135 = vector.shape_cast %134 : vector<2xf32> to vector<2x1xf32>
    %136 = math.log %135 : vector<2x1xf32>
    %137 = vector.broadcast %136 : vector<2x1xf32> to vector<2x6xf32>
    %138 = arith.subf %132, %137 : vector<2x6xf32>
    %139 = vector.extract_strided_slice %127 {offsets = [0, 6], sizes = [2, 32], strides = [1, 1]} : vector<2x38xf32> to vector<2x32xf32>
    %cst_116 = arith.constant 0.000000e+00 : f32
    %140 = vector.broadcast %cst_116 : f32 to vector<2x32xf32>
    %141 = arith.maximumf %139, %140 : vector<2x32xf32>
    %c440 = arith.constant 440 : index
    %c0_117 = arith.constant 0 : index
    %142 = vector.load %arg2[%c440, %c0_117] : memref<488x128xf32, #tpu.memory_space<vmem>>, vector<1x33xf32>
    %143 = vector.extract_strided_slice %142 {offsets = [0, 0], sizes = [1, 32], strides = [1, 1]} : vector<1x33xf32> to vector<1x32xf32>
    %144 = vector.broadcast %143 : vector<1x32xf32> to vector<2x32xf32>
    %145 = arith.mulf %141, %144 : vector<2x32xf32>
    %cst_118 = arith.constant dense<0.000000e+00> : vector<2xf32>
    %146 = vector.multi_reduction <add>, %145, %cst_118 [1] : vector<2x32xf32> to vector<2xf32>
    %147 = vector.shape_cast %146 : vector<2xf32> to vector<2x1xf32>
    %148 = vector.extract_strided_slice %142 {offsets = [0, 32], sizes = [1, 1], strides = [1, 1]} : vector<1x33xf32> to vector<1x1xf32>
    %149 = vector.broadcast %148 : vector<1x1xf32> to vector<2x1xf32>
    %150 = arith.addf %147, %149 : vector<2x1xf32>
    %151 = math.tanh %150 : vector<2x1xf32>
    %cst_119 = arith.constant 0.000000e+00 : f32
    %152 = vector.broadcast %cst_119 : f32 to vector<2x121xf32>
    %153 = tpu.concatenate %138, %151, %152 in 1 : vector<2x6xf32>, vector<2x1xf32>, vector<2x121xf32> -> vector<2x128xf32>
    %c0_120 = arith.constant 0 : index
    %c0_121 = arith.constant 0 : index
    %154 = vector.load %arg4[%c0_120, %c0_121] : memref<2x128xf32, #tpu.memory_space<vmem>>, vector<2x128xf32>
    tpu.vector_store %arg4[%c0_120, %c0_121], %153 {strides = array<i32>} : memref<2x128xf32, #tpu.memory_space<vmem>>, vector<2x128xf32>,
    return
  }
}

</mosaic_0001>

<bundles_post_ra>
// kernel: tpu_custom_call.1
= control target key start
LH: loop header
LB: loop body
LE: loop exit
PB: predicated region body
PF: predicated region fallthrough
CT: control target
= control target key end

     0   :  { %vm50_vm0 = vcmask 1046528   ;;  %vm37_vm1 = vcmask 121856   ;;  %vm18_vm2 = vcmask 261120   ;;  %v2483_v4 = vmov 0.0   ;;  %s3482_s0 = inlined_call_operand.vmem [shape: f32[15,2], index: 0, kind: input, shape index: {}]   ;;  %s3483_s1 = inlined_call_operand.vmem [shape: f32[512,32], index: 1, kind: input, shape index: {}]   ;;  %s3484_s2 = inlined_call_operand.vmem [shape: f32[488,128], index: 2, kind: input, shape index: {}]   ;;  %s3485_s3 = inlined_call_operand.vmem [shape: f32[72,256], index: 3, kind: input, shape index: {}]   ;;  %s3486_s4 = inlined_call_operand.hbm [shape: f32[2,128], index: 4, kind: output, shape index: {}]  }
   0x1   :  { %v36_v0 = vld [vmem:[%s3482_s0 + $0x8] sm:$0x7f]  ;;  %v35_v1 = vld [vmem:[%s3482_s0] sm:$0xff]  ;;  %v32_v3 = vld [vmem:[%s3484_s2 + $0x10] sm:$0xff]  ;;  %21 = vst.msk [vmem:[#allocation2 + $0x10] sm:$0xff] %vm18_vm2, %v2483_v4 }
   0x2   :  { %v31_v2 = vld [vmem:[%s3484_s2 + $0x8] sm:$0xff]  ;;  %2222 = vmatprep.subr.msk.mxu1 %vm50_vm0, %v36_v0  ;;  %19 = vst.msk [vmem:[#allocation2] sm:$0xff] %vm18_vm2, %v2483_v4  ;;  %20 = vst.msk [vmem:[#allocation2 + $0x8] sm:$0xff] %vm18_vm2, %v2483_v4 }
   0x3   :  { %2226 = vmatprep.mubr.msk.f32.mxu1 %vm37_vm1, %v31_v2  ;;  %2223 = vmatpush3.msk.msra.mxu1 %vm50_vm0, %v36_v0  ;;  %22 = vst.msk [vmem:[#allocation2 + $0x18] sm:$0xff] %vm18_vm2, %v2483_v4  ;;  %23 = vst.msk [vmem:[#allocation2 + $0x20] sm:$0xff] %vm18_vm2, %v2483_v4 }
   0x4   :  { %24 = vst.msk [vmem:[#allocation2 + $0x28] sm:$0xff] %vm18_vm2, %v2483_v4  ;;  %25 = vst.msk [vmem:[#allocation2 + $0x30] sm:$0xff] %vm18_vm2, %v2483_v4 }
   0x5   :  { %26 = vst.msk [vmem:[#allocation2 + $0x38] sm:$0xff] %vm18_vm2, %v2483_v4  ;;  %27 = vst.msk [vmem:[#allocation2 + $0x40] sm:$0xff] %vm18_vm2, %v2483_v4 }
   0x6   :  { %28 = vst.msk [vmem:[#allocation2 + $0x48] sm:$0xff] %vm18_vm2, %v2483_v4  ;;  %29 = vst.msk [vmem:[#allocation2 + $0x50] sm:$0xff] %vm18_vm2, %v2483_v4 }
   0x7   :  { %30 = vst.msk [vmem:[#allocation2 + $0x58] sm:$0xff] %vm18_vm2, %v2483_v4 }
   0x8   :  { %9 = vsyncpa [#allocation4], 0  ;;  %2224 = vmatprep.subr.mxu1 %v35_v1  ;;  %v33_v5 = vld [vmem:[%s3484_s2 + $0x18] sm:$0xff]  ;;  %v34_v6 = vld [vmem:[%s3484_s2 + $0x20] sm:$0xff]  ;;  %vm143_vm3 = vcmask 7168   ;;  %s2484_s26 = smov 127  }
   0x9   :  { %2225 = vmatpush3.msra.mxu1 %v35_v1  ;;  %v274_v15 = vld [vmem:[%s3484_s2] sm:$0x7]  ;;  %vm305_vm4 = vcmask 1042432   ;;  %s2485_s29 = smov 1   ;;  %s2486_s30 = smov 2   ;;  %vm265_vm5 = vcmask 15360  }
   0xa   :  { %2227 = vmatmul.mubr.msk.f32.vlgmr.msra.gmra.mxu1 %vm37_vm1, %v32_v3  ;;  %2232 = vmatprep.subr.msk.mxu1 %vm305_vm4, %v274_v15  ;;  %vm280_vm6 = vcmask 23552   ;;  %v546_v56 = vld [vmem:[%s3483_s1 + $0x58] sm:$0xff]  ;;  %s2488_s5 = smov 64   ;;  %vm526_vm7 = vcmask 523264   ;;  %vm552_vm8 = vcmask 785408   ;;  %s2489_s23 = smov 96  }
   0xb   :  { %2229 = vmatprep.mubr.msk.f32.mxu1 %vm37_vm1, %v33_v5  ;;  %2233 = vmatpush3.msk.msra.mxu1 %vm305_vm4, %v274_v15  ;;  %v544_v15 = vld [vmem:[%s3483_s1 + $0x48] sm:$0xff]  ;;  %vm1688_vm9 = vcmask 1041409   ;;  %vm2490_vm10 = vmmov 0   ;;  %s2491_s13 = smov 6   ;;  %vm2002_vm11 = vcmask 41984   ;;  %vm2030_vm12 = vcmask 254976  }
   0xc   :  { %1181 = vmatprep.subr.mxu1 %v2483_v4  ;;  %2246 = vmatprep.subr.mxu0 %v546_v56  ;;  %vm2040_vm13 = vcmask 48128   ;;  %vm2042_vm14 = vcmask 56320  }
   0xd   :  { %2247 = vmatpush3.msra.mxu0 %v546_v56 }
   0xe   :  { %2230 = vmatmul.mubr.msk.f32.gmra.mxu1 %vm37_vm1, %v34_v6 }
  0xca   :  { %v2228_v7 = vpop.f32.mrf.mxu1 }
  0xcb   :  { %v140_v8 = vmax.f32 %v2228_v7, 0.0 }
  0xcc   :  { %v120_v9 = vpop.f32.mrf.mxu1 }
  0xcd   :  { %145 = vst.msk [vmem:[#allocation2 + $0x10] sm:$0xff] %vm143_vm3, %v140_v8  ;;  %v139_v10 = vmax.f32 %v120_v9, 0.0 }
  0xce   :  { %v2231_v11 = vpop.f32.mrf.mxu1 }
  0xcf   :  { %144 = vst.msk [vmem:[#allocation2 + $0x8] sm:$0xff] %vm143_vm3, %v139_v10  ;;  %v142_v12 = vmax.f32 %v2231_v11, 0.0  ;;  %152 = vrot.lane.b32.xlu0 %v139_v10, %s2484_s26 }
  0xd0   :  { %v130_v13 = vpop.f32.mrf.mxu1 }
  0xd1   :  { %147 = vst.msk [vmem:[#allocation2 + $0x20] sm:$0xff] %vm143_vm3, %v142_v12  ;;  %v141_v14 = vmax.f32 %v130_v13, 0.0 }
  0xd3   :  { %146 = vst.msk [vmem:[#allocation2 + $0x18] sm:$0xff] %vm143_vm3, %v141_v14  ;;  %154 = vrot.lane.b32.xlu0 %v140_v8, %s2484_s26  ;;  %156 = vrot.lane.b32.xlu1 %v141_v14, %s2484_s26  ;;  %v545_v14 = vld [vmem:[%s3483_s1 + $0x50] sm:$0xff] }
  0xd4   :  { %v178_v17 = vld [vmem:[#allocation2 + $0x10] sm:$0xff]  ;;  %2248 = vmatprep.subr.mxu0 %v545_v14 }
  0xd5   :  { %2249 = vmatpush3.msra.mxu0 %v545_v14 }
  0xd6   :  { %v177_v16 = vld [vmem:[#allocation2 + $0x8] sm:$0xff]  ;;  %2250 = vmatprep.subr.mxu0 %v544_v15 }
  0xd7   :  { %158 = vrot.lane.b32.xlu1 %v142_v12, %s2484_s26  ;;  %201 = vrot.lane.b32.xlu0 %v177_v16, %s2485_s29  ;;  %v185_v18 = vld [vmem:[#allocation2 + $0x9] sm:$0xff]  ;;  %v543_v16 = vld [vmem:[%s3483_s1 + $0x40] sm:$0xff] }
  0xd8   :  { %v180_v19 = vld [vmem:[#allocation2 + $0x20] sm:$0xff]  ;;  %v170_v41 = vld [vmem:[#allocation2 + $0xf] sm:$0xff]  ;;  %2251 = vmatpush3.msra.mxu0 %v544_v15 }
  0xd9   :  { %v188_v23 = vld [vmem:[#allocation2 + $0x21] sm:$0xff]  ;;  %2252 = vmatprep.subr.mxu0 %v543_v16 }
  0xda   :  { %v179_v20 = vld [vmem:[#allocation2 + $0x18] sm:$0xff]  ;;  %v169_v30 = vld [vmem:[#allocation2 + $0x7] sm:$0xff]  ;;  %2253 = vmatpush3.msra.mxu0 %v543_v16 }
  0xdb   :  { %203 = vrot.lane.b32.xlu1 %v178_v17, %s2485_s29  ;;  %233 = vrot.lane.b32.xlu0 %v185_v18, %s2486_s30  ;;  %v186_v21 = vld [vmem:[#allocation2 + $0x11] sm:$0xff]  ;;  %v187_v22 = vld [vmem:[#allocation2 + $0x19] sm:$0xff] }
  0xdc   :  { %v171_v42 = vld [vmem:[#allocation2 + $0x17] sm:$0xff]  ;;  %v172_v51 = vld [vmem:[#allocation2 + $0x1f] sm:$0xff] }
  0xdd   :  { %v542_v17 = vld [vmem:[%s3483_s1 + $0x38] sm:$0xff]  ;;  %v541_v18 = vld [vmem:[%s3483_s1 + $0x30] sm:$0xff] }
  0xde   :  { %2254 = vmatprep.subr.mxu0 %v542_v17 }
  0xdf   :  { %207 = vrot.lane.b32.xlu1 %v180_v19, %s2485_s29  ;;  %205 = vrot.lane.b32.xlu0 %v179_v20, %s2485_s29  ;;  %v540_v19 = vld [vmem:[%s3483_s1 + $0x28] sm:$0xff]  ;;  %v2642_v20 = vld [vmem:[%s3484_s2 + $0x1c0] ss:$0 sm:$0xff] }
  0xe0   :  { %2255 = vmatpush3.msra.mxu0 %v542_v17 }
  0xe1   :  { %2256 = vmatprep.subr.mxu0 %v541_v18 }
  0xe2   :  { %2257 = vmatpush3.msra.mxu0 %v541_v18 }
  0xe3   :  { %235 = vrot.lane.b32.xlu1 %v186_v21, %s2486_s30  ;;  %237 = vrot.lane.b32.xlu0 %v187_v22, %s2486_s30  ;;  %v539_v21 = vld [vmem:[%s3483_s1 + $0x20] sm:$0xff] }
  0xe4   :  { %2258 = vmatprep.subr.mxu0 %v540_v19 }
  0xe5   :  { %2259 = vmatpush3.msra.mxu0 %v540_v19 }
  0xe6   :  { %2260 = vmatprep.subr.mxu0 %v539_v21 }
  0xe7   :  { %239 = vrot.lane.b32.xlu1 %v188_v23, %s2486_s30  ;;  %v538_v23 = vld [vmem:[%s3483_s1 + $0x18] sm:$0xff]  ;;  %2261 = vmatpush3.msra.mxu0 %v539_v21 }
  0xe8   :  { %2262 = vmatprep.subr.mxu0 %v538_v23 }
  0xe9   :  { %2263 = vmatpush3.msra.mxu0 %v538_v23  ;;  %v813_v23 = vld [vmem:[%s3483_s1 + $0xb8] sm:$0xff] }
 0x141   :  { %v153_v24 = vpop.permute.xlu0 %152 }
 0x142   :  { %165 = vst.msk [vmem:[#allocation2 + $0x38] sm:$0xff] %vm143_vm3, %v153_v24 }
 0x145   :  { %v155_v25 = vpop.permute.xlu0 %154  ;;  %v157_v26 = vpop.permute.xlu1 %156 }
 0x146   :  { %166 = vst.msk [vmem:[#allocation2 + $0x40] sm:$0xff] %vm143_vm3, %v155_v25  ;;  %167 = vst.msk [vmem:[#allocation2 + $0x48] sm:$0xff] %vm143_vm3, %v157_v26  ;;  %v537_v26 = vld [vmem:[%s3483_s1 + $0x10] sm:$0xff] }
 0x147   :  { %2264 = vmatprep.subr.mxu0 %v537_v26 }
 0x148   :  { %2265 = vmatpush3.msra.mxu0 %v537_v26 }
 0x149   :  { %v159_v27 = vpop.permute.xlu1 %158  ;;  %v202_v28 = vpop.permute.xlu0 %201  ;;  %v181_v29 = vld [vmem:[#allocation2 + $0x38] sm:$0xff] }
 0x14a   :  { %168 = vst.msk [vmem:[#allocation2 + $0x50] sm:$0xff] %vm143_vm3, %v159_v27  ;;  %209 = vrot.lane.b32.xlu0 %v181_v29, %s2485_s29  ;;  %v257_v31 = vsel %vm143_vm3, %v169_v30, %v202_v28  ;;  %v173_v58 = vld [vmem:[#allocation2 + $0x37] sm:$0xff]  ;;  %v536_v30 = vld [vmem:[%s3483_s1 + $0x8] sm:$0xff] }
 0x14b   :  { %2266 = vmatprep.subr.mxu0 %v536_v30 }
 0x14c   :  { %2267 = vmatpush3.msra.mxu0 %v536_v30 }
 0x14d   :  { %v204_v32 = vpop.permute.xlu1 %203  ;;  %v234_v33 = vpop.permute.xlu0 %233  ;;  %v182_v34 = vld [vmem:[#allocation2 + $0x40] sm:$0xff]  ;;  %v183_v40 = vld [vmem:[#allocation2 + $0x48] sm:$0xff] }
 0x14e   :  { %v189_v35 = vld [vmem:[#allocation2 + $0x39] sm:$0xff]  ;;  %v266_v36 = vsel %vm265_vm5, %v257_v31, %v234_v33  ;;  %211 = vrot.lane.b32.xlu1 %v182_v34, %s2485_s29  ;;  %v258_v43 = vsel %vm143_vm3, %v170_v41, %v204_v32  ;;  %v190_v47 = vld [vmem:[#allocation2 + $0x41] sm:$0xff] }
 0x14f   :  { %241 = vrot.lane.b32.xlu0 %v189_v35, %s2486_s30  ;;  %2234 = vmatprep.mubr.msk.f32.mxu1 %vm280_vm6, %v266_v36  ;;  %v174_v1 = vld [vmem:[#allocation2 + $0x3f] sm:$0xff]  ;;  %v175_v2 = vld [vmem:[#allocation2 + $0x47] sm:$0xff] }
 0x150   :  { %v535_v34 = vld [vmem:[%s3483_s1] sm:$0xff] }
 0x151   :  { %v208_v37 = vpop.permute.xlu1 %207  ;;  %v206_v38 = vpop.permute.xlu0 %205  ;;  %v184_v39 = vld [vmem:[#allocation2 + $0x50] sm:$0xff]  ;;  %2268 = vmatprep.subr.mxu0 %v535_v34 }
 0x152   :  { %215 = vrot.lane.b32.xlu1 %v184_v39, %s2485_s29  ;;  %v259_v44 = vsel %vm143_vm3, %v171_v42, %v206_v38  ;;  %v191_v48 = vld [vmem:[#allocation2 + $0x49] sm:$0xff]  ;;  %v260_v52 = vsel %vm143_vm3, %v172_v51, %v208_v37  ;;  %v192_v54 = vld [vmem:[#allocation2 + $0x51] sm:$0xff]  ;;  %2269 = vmatpush3.msra.mxu0 %v535_v34 }
 0x153   :  { %213 = vrot.lane.b32.xlu0 %v183_v40, %s2485_s29  ;;  %v176_v10 = vld [vmem:[#allocation2 + $0x4f] sm:$0xff]  ;;  %2282 = vmatprep.subr.mxu0 %v813_v23 }
 0x155   :  { %v236_v45 = vpop.permute.xlu1 %235  ;;  %v238_v46 = vpop.permute.xlu0 %237 }
 0x156   :  { %v267_v49 = vsel %vm265_vm5, %v258_v43, %v236_v45  ;;  %v268_v50 = vsel %vm265_vm5, %v259_v44, %v238_v46  ;;  %243 = vrot.lane.b32.xlu1 %v190_v47, %s2486_s30 }
 0x157   :  { %245 = vrot.lane.b32.xlu0 %v191_v48, %s2486_s30  ;;  %2235 = vmatmul.mubr.msk.f32.vlgmr.msra.gmra.mxu1 %vm280_vm6, %v267_v49 }
 0x158   :  { %2237 = vmatprep.mubr.msk.f32.mxu1 %vm280_vm6, %v268_v50 }
 0x159   :  { %v240_v53 = vpop.permute.xlu1 %239 }
 0x15a   :  { %v269_v55 = vsel %vm265_vm5, %v260_v52, %v240_v53  ;;  %247 = vrot.lane.b32.xlu1 %v192_v54, %s2486_s30  ;;  %s2487_s30 = smov 32  }
 0x15b   :  { %2238 = vmatmul.mubr.msk.f32.gmra.mxu1 %vm280_vm6, %v269_v55 }
 0x1bc   :  { %v210_v57 = vpop.permute.xlu0 %209 }
 0x1bd   :  { %v261_v59 = vsel %vm143_vm3, %v173_v58, %v210_v57 }
 0x1c0   :  { %v212_v60 = vpop.permute.xlu1 %211 }
 0x1c1   :  { %v242_v61 = vpop.permute.xlu0 %241  ;;  %v262_v3 = vsel %vm143_vm3, %v174_v1, %v212_v60 }
 0x1c2   :  { %v270_v62 = vsel %vm265_vm5, %v261_v59, %v242_v61 }
 0x1c3   :  { %2240 = vmatprep.mubr.msk.f32.mxu1 %vm280_vm6, %v270_v62 }
 0x1c4   :  { %v216_v63 = vpop.permute.xlu1 %215 }
 0x1c5   :  { %v214_v0 = vpop.permute.xlu0 %213  ;;  %v264_v11 = vsel %vm143_vm3, %v176_v10, %v216_v63 }
 0x1c6   :  { %v263_v5 = vsel %vm143_vm3, %v175_v2, %v214_v0 }
 0x1c8   :  { %v244_v6 = vpop.permute.xlu1 %243 }
 0x1c9   :  { %v246_v7 = vpop.permute.xlu0 %245  ;;  %v271_v8 = vsel %vm265_vm5, %v262_v3, %v244_v6 }
 0x1ca   :  { %v272_v9 = vsel %vm265_vm5, %v263_v5, %v246_v7  ;;  %2241 = vmatmul.mubr.msk.f32.gmra.mxu1 %vm280_vm6, %v271_v8 }
 0x1cb   :  { %2243 = vmatprep.mubr.msk.f32.mxu1 %vm280_vm6, %v272_v9 }
 0x1cc   :  { %v248_v12 = vpop.permute.xlu1 %247 }
 0x1cd   :  { %v273_v13 = vsel %vm265_vm5, %v264_v11, %v248_v12 }
 0x1ce   :  { %2244 = vmatmul.mubr.msk.f32.gmra.mxu1 %vm280_vm6, %v273_v13 }
 0x217   :  { %v2236_v22 = vpop.f32.mrf.mxu1 }
 0x218   :  { %v2651_v24 = vadd.f32 %v2236_v22, %v2642_v20 }
 0x219   :  { %v375_v25 = vpop.f32.mrf.mxu1 }
 0x21a   :  { %v415_v27 = vmax.f32 %v2651_v24, 0.0  ;;  %v2658_v28 = vadd.f32 %v2642_v20, %v375_v25  ;;  %v1133_v24 = vld [vmem:[%s3483_s1 + $0xc8] sm:$0xff] }
 0x21b   :  { %v2239_v29 = vpop.f32.mrf.mxu1 }
 0x21c   :  { %423 = vst.msk [vmem:[#allocation2 + $0x10] sm:$0xff] %vm18_vm2, %v415_v27  ;;  %v414_v31 = vmax.f32 %v2658_v28, 0.0  ;;  %v2668_v32 = vadd.f32 %v2239_v29, %v2642_v20  ;;  %v1132_v28 = vld [vmem:[%s3483_s1 + $0xc0] sm:$0xff] }
 0x21d   :  { %v385_v33 = vpop.f32.mrf.mxu1 }
 0x21e   :  { %422 = vst.msk [vmem:[#allocation2 + $0x8] sm:$0xff] %vm18_vm2, %v414_v31  ;;  %v417_v35 = vmax.f32 %v2668_v32, 0.0  ;;  %v2678_v36 = vadd.f32 %v2642_v20, %v385_v33  ;;  %v1149_v32 = vld [vmem:[%s3483_s1 + $0x148] sm:$0xff] }
 0x220   :  { %425 = vst.msk [vmem:[#allocation2 + $0x20] sm:$0xff] %vm18_vm2, %v417_v35  ;;  %v416_v37 = vmax.f32 %v2678_v36, 0.0 }
 0x222   :  { %424 = vst.msk [vmem:[#allocation2 + $0x18] sm:$0xff] %vm18_vm2, %v416_v37 }
 0x223   :  { %v439_v38 = vld [vmem:[#allocation2 + $0x10] sm:$0xff] }
 0x224   :  { %464 = vrot.lane.b32.xlu1 %v439_v38, %s2487_s30 }
 0x225   :  { %v438_v39 = vld [vmem:[#allocation2 + $0x8] sm:$0xff] }
 0x226   :  { %462 = vrot.lane.b32.xlu0 %v438_v39, %s2487_s30  ;;  %v446_v41 = vld [vmem:[#allocation2 + $0x9] sm:$0xff] }
 0x227   :  { %v441_v40 = vld [vmem:[#allocation2 + $0x20] sm:$0xff]  ;;  %v431_v5 = vld [vmem:[#allocation2 + $0xf] sm:$0xff] }
 0x228   :  { %468 = vrot.lane.b32.xlu1 %v441_v40, %s2487_s30  ;;  %v449_v44 = vld [vmem:[#allocation2 + $0x21] sm:$0xff] }
 0x229   :  { %v447_v42 = vld [vmem:[#allocation2 + $0x11] sm:$0xff]  ;;  %v448_v45 = vld [vmem:[#allocation2 + $0x19] sm:$0xff]  ;;  %v430_v0 = vld [vmem:[#allocation2 + $0x7] sm:$0xff] }
 0x22a   :  { %494 = vrot.lane.b32.xlu0 %v446_v41, %s2488_s5  ;;  %v440_v43 = vld [vmem:[#allocation2 + $0x18] sm:$0xff] }
 0x22b   :  { %v432_v14 = vld [vmem:[#allocation2 + $0x17] sm:$0xff]  ;;  %v433_v16 = vld [vmem:[#allocation2 + $0x1f] sm:$0xff] }
 0x22c   :  { %496 = vrot.lane.b32.xlu1 %v447_v42, %s2488_s5 }
 0x22e   :  { %466 = vrot.lane.b32.xlu0 %v440_v43, %s2487_s30 }
 0x230   :  { %500 = vrot.lane.b32.xlu1 %v449_v44, %s2488_s5 }
 0x232   :  { %498 = vrot.lane.b32.xlu0 %v448_v45, %s2488_s5 }
 0x28a   :  { %v2242_v46 = vpop.f32.mrf.mxu1 }
 0x28b   :  { %v2696_v47 = vadd.f32 %v2242_v46, %v2642_v20 }
 0x28c   :  { %v395_v48 = vpop.f32.mrf.mxu1 }
 0x28d   :  { %v419_v49 = vmax.f32 %v2696_v47, 0.0  ;;  %v2700_v50 = vadd.f32 %v2642_v20, %v395_v48 }
 0x28e   :  { %v2245_v51 = vpop.f32.mrf.mxu1 }
 0x28f   :  { %427 = vst.msk [vmem:[#allocation2 + $0x40] sm:$0xff] %vm18_vm2, %v419_v49  ;;  %v418_v52 = vmax.f32 %v2700_v50, 0.0  ;;  %v2707_v53 = vadd.f32 %v2245_v51, %v2642_v20 }
 0x290   :  { %v405_v54 = vpop.f32.mrf.mxu1 }
 0x291   :  { %426 = vst.msk [vmem:[#allocation2 + $0x38] sm:$0xff] %vm18_vm2, %v418_v52  ;;  %v421_v55 = vmax.f32 %v2707_v53, 0.0  ;;  %v2714_v56 = vadd.f32 %v2642_v20, %v405_v54 }
 0x293   :  { %429 = vst.msk [vmem:[#allocation2 + $0x50] sm:$0xff] %vm18_vm2, %v421_v55  ;;  %v420_v57 = vmax.f32 %v2714_v56, 0.0 }
 0x295   :  { %428 = vst.msk [vmem:[#allocation2 + $0x48] sm:$0xff] %vm18_vm2, %v420_v57 }
 0x296   :  { %v465_v58 = vpop.permute.xlu1 %464  ;;  %v443_v59 = vld [vmem:[#allocation2 + $0x40] sm:$0xff] }
 0x297   :  { %472 = vrot.lane.b32.xlu1 %v443_v59, %s2487_s30  ;;  %v519_v7 = vsel %vm18_vm2, %v431_v5, %v465_v58  ;;  %v806_v5 = vld [vmem:[%s3483_s1 + $0x80] sm:$0xff] }
 0x298   :  { %v463_v60 = vpop.permute.xlu0 %462  ;;  %v442_v61 = vld [vmem:[#allocation2 + $0x38] sm:$0xff] }
 0x299   :  { %470 = vrot.lane.b32.xlu0 %v442_v61, %s2487_s30  ;;  %v518_v1 = vsel %vm18_vm2, %v430_v0, %v463_v60  ;;  %v450_v3 = vld [vmem:[#allocation2 + $0x39] sm:$0xff]  ;;  %v812_v60 = vld [vmem:[%s3483_s1 + $0xb0] sm:$0xff]  ;;  %v811_v61 = vld [vmem:[%s3483_s1 + $0xa8] sm:$0xff] }
 0x29a   :  { %v469_v62 = vpop.permute.xlu1 %468  ;;  %v445_v63 = vld [vmem:[#allocation2 + $0x50] sm:$0xff]  ;;  %v435_v38 = vld [vmem:[#allocation2 + $0x3f] sm:$0xff] }
 0x29b   :  { %476 = vrot.lane.b32.xlu1 %v445_v63, %s2487_s30  ;;  %v453_v13 = vld [vmem:[#allocation2 + $0x51] sm:$0xff]  ;;  %v521_v20 = vsel %vm18_vm2, %v433_v16, %v469_v62  ;;  %v810_v62 = vld [vmem:[%s3483_s1 + $0xa0] sm:$0xff] }
 0x29c   :  { %v495_v2 = vpop.permute.xlu0 %494  ;;  %v451_v9 = vld [vmem:[#allocation2 + $0x41] sm:$0xff]  ;;  %v452_v19 = vld [vmem:[#allocation2 + $0x49] sm:$0xff]  ;;  %v434_v30 = vld [vmem:[#allocation2 + $0x37] sm:$0xff] }
 0x29d   :  { %502 = vrot.lane.b32.xlu0 %v450_v3, %s2488_s5  ;;  %v527_v6 = vsel %vm526_vm7, %v518_v1, %v495_v2  ;;  %v444_v12 = vld [vmem:[#allocation2 + $0x48] sm:$0xff]  ;;  %v809_v63 = vld [vmem:[%s3483_s1 + $0x98] sm:$0xff]  ;;  %v808_v0 = vld [vmem:[%s3483_s1 + $0x90] sm:$0xff] }
 0x29e   :  { %v497_v8 = vpop.permute.xlu1 %496  ;;  %2270 = vmatprep.mubr.msk.f32.mxu0 %vm552_vm8, %v527_v6  ;;  %v436_v44 = vld [vmem:[#allocation2 + $0x47] sm:$0xff]  ;;  %v437_v46 = vld [vmem:[#allocation2 + $0x4f] sm:$0xff] }
 0x29f   :  { %v528_v10 = vsel %vm526_vm7, %v519_v7, %v497_v8  ;;  %504 = vrot.lane.b32.xlu1 %v451_v9, %s2488_s5  ;;  %v2776_v1 = vld [vmem:[%s3484_s2 + $0x1c8] ss:$0 sm:$0xff]  ;;  %v805_v8 = vld [vmem:[%s3483_s1 + $0x78] sm:$0xff]  ;;  %v804_v9 = vld [vmem:[%s3483_s1 + $0x70] sm:$0xff] }
 0x2a0   :  { %v467_v11 = vpop.permute.xlu0 %466  ;;  %2271 = vmatmul.mubr.msk.f32.vlgmr.msra.gmra.mxu0 %vm552_vm8, %v528_v10  ;;  %v807_v2 = vld [vmem:[%s3483_s1 + $0x88] sm:$0xff] }
 0x2a1   :  { %474 = vrot.lane.b32.xlu0 %v444_v12, %s2487_s30  ;;  %v520_v17 = vsel %vm18_vm2, %v432_v14, %v467_v11  ;;  %2283 = vmatpush3.msra.mxu0 %v813_v23 }
 0x2a2   :  { %v501_v15 = vpop.permute.xlu1 %500  ;;  %2284 = vmatprep.subr.mxu0 %v812_v60 }
 0x2a3   :  { %508 = vrot.lane.b32.xlu1 %v453_v13, %s2488_s5  ;;  %v530_v22 = vsel %vm526_vm7, %v521_v20, %v501_v15  ;;  %2285 = vmatpush3.msra.mxu0 %v812_v60  ;;  %v803_v13 = vld [vmem:[%s3483_s1 + $0x68] sm:$0xff]  ;;  %v802_v15 = vld [vmem:[%s3483_s1 + $0x60] sm:$0xff] }
 0x2a4   :  { %v499_v18 = vpop.permute.xlu0 %498  ;;  %2286 = vmatprep.subr.mxu0 %v811_v61 }
 0x2a5   :  { %v529_v21 = vsel %vm526_vm7, %v520_v17, %v499_v18  ;;  %506 = vrot.lane.b32.xlu0 %v452_v19, %s2488_s5  ;;  %2287 = vmatpush3.msra.mxu0 %v811_v61 }
 0x2a6   :  { %2273 = vmatprep.mubr.msk.f32.mxu0 %vm552_vm8, %v529_v21  ;;  %2288 = vmatprep.subr.mxu0 %v810_v62 }
 0x2a7   :  { %2274 = vmatmul.mubr.msk.f32.gmra.mxu0 %vm552_vm8, %v530_v22 }
 0x2a8   :  { %2289 = vmatpush3.msra.mxu0 %v810_v62 }
 0x2a9   :  { %2290 = vmatprep.subr.mxu0 %v809_v63 }
 0x2aa   :  { %2291 = vmatpush3.msra.mxu0 %v809_v63 }
 0x2ab   :  { %2292 = vmatprep.subr.mxu0 %v808_v0 }
 0x2ac   :  { %2293 = vmatpush3.msra.mxu0 %v808_v0 }
 0x2ad   :  { %2294 = vmatprep.subr.mxu0 %v807_v2 }
 0x2ae   :  { %2295 = vmatpush3.msra.mxu0 %v807_v2 }
 0x2af   :  { %2296 = vmatprep.subr.mxu0 %v806_v5 }
 0x2b0   :  { %2297 = vmatpush3.msra.mxu0 %v806_v5 }
 0x2b1   :  { %2298 = vmatprep.subr.mxu0 %v805_v8 }
 0x2b2   :  { %2299 = vmatpush3.msra.mxu0 %v805_v8 }
 0x2b3   :  { %2300 = vmatprep.subr.mxu0 %v804_v9 }
 0x2b4   :  { %2301 = vmatpush3.msra.mxu0 %v804_v9 }
 0x2b5   :  { %2302 = vmatprep.subr.mxu0 %v803_v13 }
 0x2b6   :  { %2303 = vmatpush3.msra.mxu0 %v803_v13 }
 0x2b7   :  { %2304 = vmatprep.subr.mxu0 %v802_v15 }
 0x2b8   :  { %2305 = vmatpush3.msra.mxu0 %v802_v15 }
 0x2b9   :  { %1511 = vmatprep.subr.mxu0 %v2483_v4 }
 0x309   :  { %v473_v25 = vpop.permute.xlu1 %472 }
 0x30a   :  { %v523_v40 = vsel %vm18_vm2, %v435_v38, %v473_v25 }
 0x30b   :  { %v471_v26 = vpop.permute.xlu0 %470 }
 0x30c   :  { %v522_v33 = vsel %vm18_vm2, %v434_v30, %v471_v26 }
 0x30d   :  { %v477_v29 = vpop.permute.xlu1 %476 }
 0x30e   :  { %v525_v54 = vsel %vm18_vm2, %v437_v46, %v477_v29 }
 0x30f   :  { %v503_v34 = vpop.permute.xlu0 %502 }
 0x310   :  { %v531_v39 = vsel %vm526_vm7, %v522_v33, %v503_v34 }
 0x311   :  { %v505_v41 = vpop.permute.xlu1 %504  ;;  %2276 = vmatprep.mubr.msk.f32.mxu0 %vm552_vm8, %v531_v39 }
 0x312   :  { %v532_v42 = vsel %vm526_vm7, %v523_v40, %v505_v41 }
 0x313   :  { %v475_v43 = vpop.permute.xlu0 %474  ;;  %2277 = vmatmul.mubr.msk.f32.gmra.mxu0 %vm552_vm8, %v532_v42 }
 0x314   :  { %v524_v48 = vsel %vm18_vm2, %v436_v44, %v475_v43 }
 0x315   :  { %v509_v45 = vpop.permute.xlu1 %508 }
 0x316   :  { %v534_v59 = vsel %vm526_vm7, %v525_v54, %v509_v45 }
 0x317   :  { %v507_v51 = vpop.permute.xlu0 %506 }
 0x318   :  { %v533_v58 = vsel %vm526_vm7, %v524_v48, %v507_v51 }
 0x319   :  { %2279 = vmatprep.mubr.msk.f32.mxu0 %vm552_vm8, %v533_v58 }
 0x31a   :  { %2280 = vmatmul.mubr.msk.f32.gmra.mxu0 %vm552_vm8, %v534_v59 }
 0x360   :  { %v2272_v3 = vpop.f32.mrf.mxu0 }
 0x361   :  { %v649_v6 = vadd.f32 %v2272_v3, %v2776_v1 }
 0x362   :  { %v643_v7 = vpop.f32.mrf.mxu0 }
 0x363   :  { %v683_v10 = vmax.f32 %v649_v6, 0.0  ;;  %v644_v11 = vadd.f32 %v2776_v1, %v643_v7 }
 0x365   :  { %691 = vst.msk [vmem:[#allocation2 + $0x10] sm:$0xff] %vm18_vm2, %v683_v10  ;;  %v682_v12 = vmax.f32 %v644_v11, 0.0 }
 0x367   :  { %690 = vst.msk [vmem:[#allocation2 + $0x8] sm:$0xff] %vm18_vm2, %v682_v12  ;;  %v2275_v14 = vpop.f32.mrf.mxu0 }
 0x368   :  { %v659_v16 = vadd.f32 %v2275_v14, %v2776_v1 }
 0x369   :  { %v653_v17 = vpop.f32.mrf.mxu0 }
 0x36a   :  { %v685_v18 = vmax.f32 %v659_v16, 0.0  ;;  %v654_v19 = vadd.f32 %v2776_v1, %v653_v17 }
 0x36c   :  { %693 = vst.msk [vmem:[#allocation2 + $0x20] sm:$0xff] %vm18_vm2, %v685_v18  ;;  %v684_v20 = vmax.f32 %v654_v19, 0.0  ;;  %v707_v21 = vld [vmem:[#allocation2 + $0x10] sm:$0xff] }
 0x36d   :  { %732 = vrot.lane.b32.xlu1 %v707_v21, %s2487_s30 }
 0x36e   :  { %692 = vst.msk [vmem:[#allocation2 + $0x18] sm:$0xff] %vm18_vm2, %v684_v20  ;;  %v706_v22 = vld [vmem:[#allocation2 + $0x8] sm:$0xff] }
 0x36f   :  { %730 = vrot.lane.b32.xlu0 %v706_v22, %s2487_s30  ;;  %v714_v23 = vld [vmem:[#allocation2 + $0x9] sm:$0xff]  ;;  %v1147_v22 = vld [vmem:[%s3483_s1 + $0x138] sm:$0xff] }
 0x370   :  { %v698_v61 = vld [vmem:[#allocation2 + $0x7] sm:$0xff]  ;;  %v699_v2 = vld [vmem:[#allocation2 + $0xf] sm:$0xff]  ;;  %1182 = vmatpush1.msra.mxu1 %v1147_v22 }
 0x371   :  { %1183 = vmatprep.subr.mxu1 %v2483_v4 }
 0x373   :  { %762 = vrot.lane.b32.xlu0 %v714_v23, %s2488_s5  ;;  %v709_v29 = vld [vmem:[#allocation2 + $0x20] sm:$0xff]  ;;  %v1146_v23 = vld [vmem:[%s3483_s1 + $0x130] sm:$0xff] }
 0x374   :  { %v717_v33 = vld [vmem:[#allocation2 + $0x21] sm:$0xff]  ;;  %1184 = vmatpush1.msra.mxu1 %v1146_v23 }
 0x375   :  { %v715_v25 = vld [vmem:[#allocation2 + $0x11] sm:$0xff]  ;;  %v716_v30 = vld [vmem:[#allocation2 + $0x19] sm:$0xff]  ;;  %1185 = vmatprep.subr.mxu1 %v2483_v4 }
 0x376   :  { %v708_v26 = vld [vmem:[#allocation2 + $0x18] sm:$0xff]  ;;  %764 = vrot.lane.b32.xlu1 %v715_v25, %s2488_s5  ;;  %v1145_v25 = vld [vmem:[%s3483_s1 + $0x128] sm:$0xff] }
 0x377   :  { %734 = vrot.lane.b32.xlu0 %v708_v26, %s2487_s30  ;;  %v700_v10 = vld [vmem:[#allocation2 + $0x17] sm:$0xff]  ;;  %v701_v17 = vld [vmem:[#allocation2 + $0x1f] sm:$0xff]  ;;  %1186 = vmatpush1.msra.mxu1 %v1145_v25 }
 0x378   :  { %v1144_v26 = vld [vmem:[%s3483_s1 + $0x120] sm:$0xff]  ;;  %1187 = vmatprep.subr.mxu1 %v2483_v4 }
 0x379   :  { %1188 = vmatpush1.msra.mxu1 %v1144_v26 }
 0x37a   :  { %736 = vrot.lane.b32.xlu1 %v709_v29, %s2487_s30  ;;  %v1143_v29 = vld [vmem:[%s3483_s1 + $0x118] sm:$0xff]  ;;  %1189 = vmatprep.subr.mxu1 %v2483_v4 }
 0x37b   :  { %766 = vrot.lane.b32.xlu0 %v716_v30, %s2488_s5  ;;  %1190 = vmatpush1.msra.mxu1 %v1143_v29 }
 0x37c   :  { %1191 = vmatprep.subr.mxu1 %v2483_v4 }
 0x37e   :  { %768 = vrot.lane.b32.xlu1 %v717_v33, %s2488_s5 }
 0x3d3   :  { %v2278_v34 = vpop.f32.mrf.mxu0 }
 0x3d4   :  { %v669_v38 = vadd.f32 %v2278_v34, %v2776_v1 }
 0x3d5   :  { %v663_v39 = vpop.f32.mrf.mxu0 }
 0x3d6   :  { %v687_v40 = vmax.f32 %v669_v38, 0.0  ;;  %v664_v41 = vadd.f32 %v2776_v1, %v663_v39 }
 0x3d8   :  { %695 = vst.msk [vmem:[#allocation2 + $0x40] sm:$0xff] %vm18_vm2, %v687_v40  ;;  %v686_v42 = vmax.f32 %v664_v41, 0.0 }
 0x3da   :  { %694 = vst.msk [vmem:[#allocation2 + $0x38] sm:$0xff] %vm18_vm2, %v686_v42  ;;  %v2281_v43 = vpop.f32.mrf.mxu0 }
 0x3db   :  { %v679_v44 = vadd.f32 %v2281_v43, %v2776_v1 }
 0x3dc   :  { %v673_v45 = vpop.f32.mrf.mxu0 }
 0x3dd   :  { %v689_v46 = vmax.f32 %v679_v44, 0.0  ;;  %v674_v48 = vadd.f32 %v2776_v1, %v673_v45 }
 0x3df   :  { %697 = vst.msk [vmem:[#allocation2 + $0x50] sm:$0xff] %vm18_vm2, %v689_v46  ;;  %v688_v51 = vmax.f32 %v674_v48, 0.0  ;;  %v711_v54 = vld [vmem:[#allocation2 + $0x40] sm:$0xff]  ;;  %v733_v60 = vpop.permute.xlu1 %732 }
 0x3e0   :  { %740 = vrot.lane.b32.xlu1 %v711_v54, %s2487_s30  ;;  %v787_v3 = vsel %vm18_vm2, %v699_v2, %v733_v60  ;;  %v1139_v2 = vld [vmem:[%s3483_s1 + $0xf8] sm:$0xff] }
 0x3e1   :  { %696 = vst.msk [vmem:[#allocation2 + $0x48] sm:$0xff] %vm18_vm2, %v688_v51  ;;  %v731_v58 = vpop.permute.xlu0 %730  ;;  %v710_v59 = vld [vmem:[#allocation2 + $0x38] sm:$0xff] }
 0x3e2   :  { %738 = vrot.lane.b32.xlu0 %v710_v59, %s2487_s30  ;;  %v786_v62 = vsel %vm18_vm2, %v698_v61, %v731_v58  ;;  %v718_v0 = vld [vmem:[#allocation2 + $0x39] sm:$0xff] }
 0x3e3   :  { %v702_v34 = vld [vmem:[#allocation2 + $0x37] sm:$0xff]  ;;  %v703_v41 = vld [vmem:[#allocation2 + $0x3f] sm:$0xff] }
 0x3e5   :  { %v763_v63 = vpop.permute.xlu0 %762 }
 0x3e6   :  { %v794_v1 = vsel %vm526_vm7, %v786_v62, %v763_v63  ;;  %770 = vrot.lane.b32.xlu0 %v718_v0, %s2488_s5  ;;  %v713_v12 = vld [vmem:[#allocation2 + $0x50] sm:$0xff]  ;;  %v1141_v0 = vld [vmem:[%s3483_s1 + $0x108] sm:$0xff] }
 0x3e7   :  { %2306 = vmatprep.mubr.msk.f32.mxu0 %vm552_vm8, %v794_v1  ;;  %v721_v20 = vld [vmem:[#allocation2 + $0x51] sm:$0xff]  ;;  %v1140_v1 = vld [vmem:[%s3483_s1 + $0x100] sm:$0xff] }
 0x3e8   :  { %v765_v5 = vpop.permute.xlu1 %764  ;;  %v719_v6 = vld [vmem:[#allocation2 + $0x41] sm:$0xff]  ;;  %v720_v15 = vld [vmem:[#allocation2 + $0x49] sm:$0xff] }
 0x3e9   :  { %v712_v7 = vld [vmem:[#allocation2 + $0x48] sm:$0xff]  ;;  %v795_v8 = vsel %vm526_vm7, %v787_v3, %v765_v5  ;;  %772 = vrot.lane.b32.xlu1 %v719_v6, %s2488_s5  ;;  %v735_v9 = vpop.permute.xlu0 %734  ;;  %v1142_v63 = vld [vmem:[%s3483_s1 + $0x110] sm:$0xff] }
 0x3ea   :  { %742 = vrot.lane.b32.xlu0 %v712_v7, %s2487_s30  ;;  %2307 = vmatmul.mubr.msk.f32.vlgmr.msra.gmra.mxu0 %vm552_vm8, %v795_v8  ;;  %v788_v13 = vsel %vm18_vm2, %v700_v10, %v735_v9  ;;  %v704_v46 = vld [vmem:[#allocation2 + $0x47] sm:$0xff]  ;;  %v705_v59 = vld [vmem:[#allocation2 + $0x4f] sm:$0xff] }
 0x3eb   :  { %1192 = vmatpush1.msra.mxu1 %v1142_v63  ;;  %v1138_v3 = vld [vmem:[%s3483_s1 + $0xf0] sm:$0xff]  ;;  %v1137_v6 = vld [vmem:[%s3483_s1 + $0xe8] sm:$0xff]  ;;  %v1136_v8 = vld [vmem:[%s3483_s1 + $0xe0] sm:$0xff] }
 0x3ec   :  { %v737_v11 = vpop.permute.xlu1 %736  ;;  %1193 = vmatprep.subr.mxu1 %v2483_v4  ;;  %v2895_v5 = vld [vmem:[%s3484_s2 + $0x1d0] ss:$0 sm:$0xff] }
 0x3ed   :  { %744 = vrot.lane.b32.xlu1 %v713_v12, %s2487_s30  ;;  %v767_v14 = vpop.permute.xlu0 %766  ;;  %v789_v18 = vsel %vm18_vm2, %v701_v17, %v737_v11  ;;  %1194 = vmatpush1.msra.mxu1 %v1141_v0  ;;  %v1135_v11 = vld [vmem:[%s3483_s1 + $0xd8] sm:$0xff] }
 0x3ee   :  { %v796_v16 = vsel %vm526_vm7, %v788_v13, %v767_v14  ;;  %774 = vrot.lane.b32.xlu0 %v720_v15, %s2488_s5  ;;  %1195 = vmatprep.subr.mxu1 %v2483_v4  ;;  %v1134_v14 = vld [vmem:[%s3483_s1 + $0xd0] sm:$0xff] }
 0x3ef   :  { %2309 = vmatprep.mubr.msk.f32.mxu0 %vm552_vm8, %v796_v16  ;;  %1196 = vmatpush1.msra.mxu1 %v1140_v1 }
 0x3f0   :  { %v769_v19 = vpop.permute.xlu1 %768  ;;  %1197 = vmatprep.subr.mxu1 %v2483_v4 }
 0x3f1   :  { %v797_v21 = vsel %vm526_vm7, %v789_v18, %v769_v19  ;;  %776 = vrot.lane.b32.xlu1 %v721_v20, %s2488_s5  ;;  %1198 = vmatpush1.msra.mxu1 %v1139_v2  ;;  %v1151_v18 = vld [vmem:[%s3483_s1 + $0x158] sm:$0xff]  ;;  %v1150_v20 = vld [vmem:[%s3483_s1 + $0x150] sm:$0xff] }
 0x3f2   :  { %2310 = vmatmul.mubr.msk.f32.gmra.mxu0 %vm552_vm8, %v797_v21  ;;  %1199 = vmatprep.subr.mxu1 %v2483_v4 }
 0x3f3   :  { %1200 = vmatpush1.msra.mxu1 %v1138_v3 }
 0x3f4   :  { %1201 = vmatprep.subr.mxu1 %v2483_v4 }
 0x3f5   :  { %1202 = vmatpush1.msra.mxu1 %v1137_v6 }
 0x3f6   :  { %1203 = vmatprep.subr.mxu1 %v2483_v4 }
 0x3f7   :  { %1204 = vmatpush1.msra.mxu1 %v1136_v8 }
 0x3f8   :  { %1205 = vmatprep.subr.mxu1 %v2483_v4 }
 0x3f9   :  { %1206 = vmatpush1.msra.mxu1 %v1135_v11 }
 0x3fa   :  { %1207 = vmatprep.subr.mxu1 %v2483_v4 }
 0x3fb   :  { %1208 = vmatpush1.msra.mxu1 %v1134_v14 }
 0x3fc   :  { %1209 = vmatprep.subr.mxu1 %v2483_v4 }
 0x3fd   :  { %1210 = vmatpush1.msra.mxu1 %v1133_v24 }
 0x3fe   :  { %1211 = vmatprep.subr.mxu1 %v2483_v4 }
 0x3ff   :  { %1212 = vmatpush1.msra.mxu1 %v1132_v28 }
 0x400   :  { %1237 = vmatprep.subr.mxu1 %v2483_v4 }
 0x401   :  { %1238 = vmatpush2.msra.mxu1 %v1151_v18 }
 0x402   :  { %1239 = vmatprep.subr.mxu1 %v2483_v4 }
 0x403   :  { %1240 = vmatpush2.msra.mxu1 %v1150_v20 }
 0x404   :  { %1241 = vmatprep.subr.mxu1 %v2483_v4 }
 0x405   :  { %1242 = vmatpush2.msra.mxu1 %v1149_v32 }
 0x406   :  { %1243 = vmatprep.subr.mxu1 %v2483_v4 }
 0x452   :  { %v741_v33 = vpop.permute.xlu1 %740 }
 0x453   :  { %v791_v42 = vsel %vm18_vm2, %v703_v41, %v741_v33 }
 0x454   :  { %v739_v30 = vpop.permute.xlu0 %738 }
 0x455   :  { %v790_v38 = vsel %vm18_vm2, %v702_v34, %v739_v30 }
 0x458   :  { %v771_v39 = vpop.permute.xlu0 %770 }
 0x459   :  { %v798_v40 = vsel %vm526_vm7, %v790_v38, %v771_v39 }
 0x45a   :  { %2312 = vmatprep.mubr.msk.f32.mxu0 %vm552_vm8, %v798_v40 }
 0x45b   :  { %v773_v43 = vpop.permute.xlu1 %772 }
 0x45c   :  { %v799_v44 = vsel %vm526_vm7, %v791_v42, %v773_v43  ;;  %v743_v45 = vpop.permute.xlu0 %742 }
 0x45d   :  { %2313 = vmatmul.mubr.msk.f32.gmra.mxu0 %vm552_vm8, %v799_v44  ;;  %v792_v51 = vsel %vm18_vm2, %v704_v46, %v743_v45 }
 0x45f   :  { %v745_v48 = vpop.permute.xlu1 %744 }
 0x460   :  { %v775_v54 = vpop.permute.xlu0 %774  ;;  %v793_v60 = vsel %vm18_vm2, %v705_v59, %v745_v48 }
 0x461   :  { %v800_v58 = vsel %vm526_vm7, %v792_v51, %v775_v54 }
 0x462   :  { %2315 = vmatprep.mubr.msk.f32.mxu0 %vm552_vm8, %v800_v58 }
 0x463   :  { %v777_v61 = vpop.permute.xlu1 %776 }
 0x464   :  { %v801_v62 = vsel %vm526_vm7, %v793_v60, %v777_v61 }
 0x465   :  { %2316 = vmatmul.mubr.msk.f32.gmra.mxu0 %vm552_vm8, %v801_v62 }
 0x4aa   :  { %v2308_v7 = vpop.f32.mrf.mxu0 }
 0x4ab   :  { %v915_v9 = vadd.f32 %v2308_v7, %v2895_v5 }
 0x4ac   :  { %v909_v10 = vpop.f32.mrf.mxu0 }
 0x4ad   :  { %v2912_v12 = vadd.f32 %v915_v9, %v415_v27  ;;  %v910_v13 = vadd.f32 %v2895_v5, %v909_v10 }
 0x4af   :  { %v957_v15 = vmax.f32 %v2912_v12, 0.0  ;;  %v2922_v16 = vadd.f32 %v910_v13, %v414_v31 }
 0x4b1   :  { %965 = vst.msk [vmem:[#allocation2 + $0x10] sm:$0xff] %vm18_vm2, %v957_v15  ;;  %v956_v27 = vmax.f32 %v2922_v16, 0.0 }
 0x4b2   :  { %v2311_v17 = vpop.f32.mrf.mxu0 }
 0x4b3   :  { %964 = vst.msk [vmem:[#allocation2 + $0x8] sm:$0xff] %vm18_vm2, %v956_v27  ;;  %v925_v31 = vadd.f32 %v2311_v17, %v2895_v5 }
 0x4b4   :  { %v919_v19 = vpop.f32.mrf.mxu0 }
 0x4b5   :  { %v2949_v21 = vadd.f32 %v925_v31, %v417_v35  ;;  %v920_v22 = vadd.f32 %v2895_v5, %v919_v19  ;;  %v1148_v35 = vld [vmem:[%s3483_s1 + $0x140] sm:$0xff] }
 0x4b6   :  { %1244 = vmatpush2.msra.mxu1 %v1148_v35 }
 0x4b7   :  { %v959_v23 = vmax.f32 %v2949_v21, 0.0  ;;  %v2956_v25 = vadd.f32 %v920_v22, %v416_v37  ;;  %v1712_v21 = vld [vmem:[%s3485_s3 + $0x70] sm:$0xff] }
 0x4b8   :  { %v989_v36 = vld [vmem:[#allocation2 + $0x10] sm:$0xff] }
 0x4b9   :  { %967 = vst.msk [vmem:[#allocation2 + $0x20] sm:$0xff] %vm18_vm2, %v959_v23  ;;  %v958_v26 = vmax.f32 %v2956_v25, 0.0 }
 0x4ba   :  { %v1004_v37 = vld [vmem:[#allocation2 + $0xa] sm:$0xff] }
 0x4bb   :  { %v988_v29 = vld [vmem:[#allocation2 + $0x8] sm:$0xff]  ;;  %966 = vst.msk [vmem:[#allocation2 + $0x18] sm:$0xff] %vm18_vm2, %v958_v26  ;;  %2093 = vmatprep.mubr.msk.f32.mxu1 %vm18_vm2, %v1004_v37 }
 0x4bc   :  { %v980_v30 = vld [vmem:[#allocation2 + $0x7] sm:$0xff]  ;;  %v2370_v33 = vpack.i.bf16 %v989_v36, %v988_v29  ;;  %v981_v34 = vld [vmem:[#allocation2 + $0xf] sm:$0xff] }
 0x4bd   :  { %v2365_v38 = vpack.i.bf16 %v981_v34, %v980_v30  ;;  %v996_v39 = vld [vmem:[#allocation2 + $0x9] sm:$0xff] }
 0x4be   :  { %2371 = vrot.lane.b32.xlu1 %v2370_v33, %s2488_s5  ;;  %v972_v14 = vld [vmem:[#allocation2 + $0x6] sm:$0xff]  ;;  %v973_v30 = vld [vmem:[#allocation2 + $0xe] sm:$0xff] }
 0x4bf   :  { %2366 = vrot.lane.b32.xlu0 %v2365_v38, %s2487_s30 }
 0x4c0   :  { %v999_v48 = vld [vmem:[#allocation2 + $0x21] sm:$0xff] }
 0x4c1   :  { %v991_v51 = vld [vmem:[#allocation2 + $0x20] sm:$0xff] }
 0x4c2   :  { %v982_v40 = vld [vmem:[#allocation2 + $0x17] sm:$0xff]  ;;  %v983_v41 = vld [vmem:[#allocation2 + $0x1f] sm:$0xff] }
 0x4c3   :  { %v997_v42 = vld [vmem:[#allocation2 + $0x11] sm:$0xff]  ;;  %v2380_v43 = vpack.i.bf16 %v983_v41, %v982_v40  ;;  %v998_v45 = vld [vmem:[#allocation2 + $0x19] sm:$0xff] }
 0x4c4   :  { %v2375_v44 = vpack.i.bf16 %v997_v42, %v996_v39  ;;  %v990_v46 = vld [vmem:[#allocation2 + $0x18] sm:$0xff]  ;;  %v2390_v54 = vpack.i.bf16 %v999_v48, %v998_v45 }
 0x4c5   :  { %2381 = vrot.lane.b32.xlu1 %v2380_v43, %s2487_s30  ;;  %v2385_v58 = vpack.i.bf16 %v991_v51, %v990_v46  ;;  %v1005_v43 = vld [vmem:[#allocation2 + $0x12] sm:$0xff] }
 0x4c6   :  { %2376 = vrot.lane.b32.xlu0 %v2375_v44, %s2489_s23  ;;  %v974_v48 = vld [vmem:[#allocation2 + $0x16] sm:$0xff] }
 0x4c9   :  { %2391 = vrot.lane.b32.xlu1 %v2390_v54, %s2489_s23 }
 0x4ca   :  { %2386 = vrot.lane.b32.xlu0 %v2385_v58, %s2488_s5 }
 0x51d   :  { %v2314_v59 = vpop.f32.mrf.mxu0 }
 0x51e   :  { %v935_v60 = vadd.f32 %v2314_v59, %v2895_v5 }
 0x51f   :  { %v929_v61 = vpop.f32.mrf.mxu0 }
 0x520   :  { %v2983_v62 = vadd.f32 %v935_v60, %v419_v49  ;;  %v930_v63 = vadd.f32 %v2895_v5, %v929_v61 }
 0x522   :  { %v961_v0 = vmax.f32 %v2983_v62, 0.0  ;;  %v2989_v1 = vadd.f32 %v930_v63, %v418_v52  ;;  %v1006_v63 = vld [vmem:[#allocation2 + $0x1a] sm:$0xff] }
 0x524   :  { %969 = vst.msk [vmem:[#allocation2 + $0x40] sm:$0xff] %vm18_vm2, %v961_v0  ;;  %v960_v2 = vmax.f32 %v2989_v1, 0.0 }
 0x525   :  { %v2317_v3 = vpop.f32.mrf.mxu0 }
 0x526   :  { %968 = vst.msk [vmem:[#allocation2 + $0x38] sm:$0xff] %vm18_vm2, %v960_v2  ;;  %v945_v47 = vadd.f32 %v2317_v3, %v2895_v5 }
 0x527   :  { %v939_v49 = vpop.f32.mrf.mxu0 }
 0x528   :  { %v3001_v6 = vadd.f32 %v945_v47, %v421_v55  ;;  %v940_v50 = vadd.f32 %v2895_v5, %v939_v49  ;;  %v975_v47 = vld [vmem:[#allocation2 + $0x1e] sm:$0xff] }
 0x52a   :  { %v963_v52 = vmax.f32 %v3001_v6, 0.0  ;;  %v3007_v7 = vadd.f32 %v940_v50, %v420_v57 }
 0x52b   :  { %v993_v9 = vld [vmem:[#allocation2 + $0x40] sm:$0xff] }
 0x52c   :  { %971 = vst.msk [vmem:[#allocation2 + $0x50] sm:$0xff] %vm18_vm2, %v963_v52  ;;  %v962_v8 = vmax.f32 %v3007_v7, 0.0 }
 0x52d   :  { %v992_v10 = vld [vmem:[#allocation2 + $0x38] sm:$0xff] }
 0x52e   :  { %v984_v11 = vld [vmem:[#allocation2 + $0x37] sm:$0xff]  ;;  %v985_v53 = vld [vmem:[#allocation2 + $0x3f] sm:$0xff]  ;;  %970 = vst.msk [vmem:[#allocation2 + $0x48] sm:$0xff] %vm18_vm2, %v962_v8  ;;  %v2400_v55 = vpack.i.bf16 %v993_v9, %v992_v10 }
 0x52f   :  { %v2395_v5 = vpack.i.bf16 %v985_v53, %v984_v11  ;;  %v1000_v28 = vld [vmem:[#allocation2 + $0x39] sm:$0xff]  ;;  %v1007_v11 = vld [vmem:[#allocation2 + $0x22] sm:$0xff] }
 0x530   :  { %2401 = vrot.lane.b32.xlu1 %v2400_v55, %s2488_s5  ;;  %v2372_v56 = vpop.permute.xlu1 %2371 }
 0x531   :  { %v2367_v13 = vpop.permute.xlu0 %2366  ;;  %2396 = vrot.lane.b32.xlu0 %v2395_v5, %s2487_s30  ;;  %v2373_v24 = vunpack.i.l.bf16 %v2372_v56  ;;  %v2374_v36 = vunpack.i.h.bf16 %v2372_v56  ;;  %v1008_v5 = vld [vmem:[#allocation2 + $0x3a] sm:$0xff]  ;;  %v1476_v56 = vld [vmem:[%s3483_s1 + $0x1d0] sm:$0xff] }
 0x532   :  { %v2368_v57 = vunpack.i.l.bf16 %v2367_v13  ;;  %v2369_v18 = vunpack.i.h.bf16 %v2367_v13  ;;  %v1477_v13 = vld [vmem:[%s3483_s1 + $0x1d8] sm:$0xff] }
 0x533   :  { %v995_v45 = vld [vmem:[#allocation2 + $0x50] sm:$0xff]  ;;  %1512 = vmatpush1.msra.mxu0 %v1477_v13  ;;  %v1465_v13 = vld [vmem:[%s3483_s1 + $0x178] sm:$0xff] }
 0x534   :  { %v1108_v19 = vsel %vm18_vm2, %v972_v14, %v2368_v57  ;;  %v1109_v39 = vsel %vm18_vm2, %v973_v30, %v2369_v18  ;;  %v1003_v10 = vld [vmem:[#allocation2 + $0x51] sm:$0xff]  ;;  %1513 = vmatprep.subr.mxu0 %v2483_v4  ;;  %v1475_v57 = vld [vmem:[%s3483_s1 + $0x1c8] sm:$0xff]  ;;  %v1474_v14 = vld [vmem:[%s3483_s1 + $0x1c0] sm:$0xff] }
 0x535   :  { %v986_v17 = vld [vmem:[#allocation2 + $0x47] sm:$0xff]  ;;  %v1116_v29 = vsel %vm526_vm7, %v1108_v19, %v2373_v24  ;;  %v1117_v46 = vsel %vm526_vm7, %v1109_v39, %v2374_v36  ;;  %v987_v61 = vld [vmem:[#allocation2 + $0x4f] sm:$0xff]  ;;  %1514 = vmatpush1.msra.mxu0 %v1476_v56  ;;  %v1473_v24 = vld [vmem:[%s3483_s1 + $0x1b8] sm:$0xff] }
 0x536   :  { %v1001_v31 = vld [vmem:[#allocation2 + $0x41] sm:$0xff]  ;;  %1032 = vrot.lane.b32.xlu1 %v986_v17, %s2487_s30  ;;  %v1002_v37 = vld [vmem:[#allocation2 + $0x49] sm:$0xff]  ;;  %1515 = vmatprep.subr.mxu0 %v2483_v4 }
 0x537   :  { %v2405_v20 = vpack.i.bf16 %v1001_v31, %v1000_v28  ;;  %v2382_v22 = vpop.permute.xlu1 %2381  ;;  %v994_v42 = vld [vmem:[#allocation2 + $0x48] sm:$0xff]  ;;  %1516 = vmatpush1.msra.mxu0 %v1475_v57  ;;  %v1472_v28 = vld [vmem:[%s3483_s1 + $0x1b0] sm:$0xff] }
 0x538   :  { %v2377_v32 = vpop.permute.xlu0 %2376  ;;  %v2383_v33 = vunpack.i.l.bf16 %v2382_v22  ;;  %v2384_v51 = vunpack.i.h.bf16 %v2382_v22  ;;  %1517 = vmatprep.subr.mxu0 %v2483_v4  ;;  %v1471_v31 = vld [vmem:[%s3483_s1 + $0x1a8] sm:$0xff]  ;;  %v976_v22 = vld [vmem:[#allocation2 + $0x36] sm:$0xff] }
 0x539   :  { %v2378_v35 = vunpack.i.l.bf16 %v2377_v32  ;;  %2406 = vrot.lane.b32.xlu0 %v2405_v20, %s2489_s23  ;;  %v2379_v34 = vunpack.i.h.bf16 %v2377_v32  ;;  %1518 = vmatpush1.msra.mxu0 %v1474_v14  ;;  %v1464_v14 = vld [vmem:[%s3483_s1 + $0x170] sm:$0xff] }
 0x53a   :  { %1096 = vrot.lane.b32.xlu1 %v1002_v37, %s2489_s23  ;;  %v1110_v59 = vsel %vm18_vm2, %v974_v48, %v2383_v33  ;;  %v1111_v9 = vsel %vm18_vm2, %v975_v47, %v2384_v51  ;;  %1519 = vmatprep.subr.mxu0 %v2483_v4 }
 0x53b   :  { %v1124_v38 = vsel %vm552_vm8, %v1116_v29, %v2378_v35  ;;  %v2392_v40 = vpop.permute.xlu1 %2391  ;;  %v1125_v58 = vsel %vm552_vm8, %v1117_v46, %v2379_v34  ;;  %1520 = vmatpush1.msra.mxu0 %v1473_v24  ;;  %v977_v34 = vld [vmem:[#allocation2 + $0x3e] sm:$0xff] }
 0x53c   :  { %v2387_v41 = vpop.permute.xlu0 %2386  ;;  %1246 = vmatmul.mubr.f32.vlgmr.msra.gmra.mxu1 %v1124_v38  ;;  %v2393_v54 = vunpack.i.l.bf16 %v2392_v40  ;;  %v2394_v49 = vunpack.i.h.bf16 %v2392_v40  ;;  %1521 = vmatprep.subr.mxu0 %v2483_v4 }
 0x53d   :  { %v2388_v44 = vunpack.i.l.bf16 %v2387_v41  ;;  %1064 = vrot.lane.b32.xlu0 %v994_v42, %s2488_s5  ;;  %2094 = vmatprep.mubr.msk.f32.mxu1 %vm18_vm2, %v1005_v43  ;;  %v2389_v60 = vunpack.i.h.bf16 %v2387_v41  ;;  %v1009_v42 = vld [vmem:[#allocation2 + $0x42] sm:$0xff] }
 0x53e   :  { %1066 = vrot.lane.b32.xlu1 %v995_v45, %s2488_s5  ;;  %1522 = vmatpush1.msra.mxu0 %v1472_v28  ;;  %v978_v43 = vld [vmem:[#allocation2 + $0x46] sm:$0xff] }
 0x53f   :  { %v1118_v3 = vsel %vm526_vm7, %v1110_v59, %v2388_v44  ;;  %v1119_v53 = vsel %vm526_vm7, %v1111_v9, %v2389_v60  ;;  %1523 = vmatprep.subr.mxu0 %v2483_v4  ;;  %v979_v59 = vld [vmem:[#allocation2 + $0x4e] sm:$0xff]  ;;  %v1470_v9 = vld [vmem:[%s3483_s1 + $0x1a0] sm:$0xff] }
 0x540   :  { %1251 = vmatmul.mubr.f32.gmra.mxu1 %v1125_v58  ;;  %v1126_v50 = vsel %vm552_vm8, %v1118_v3, %v2393_v54  ;;  %v1127_v55 = vsel %vm552_vm8, %v1119_v53, %v2394_v49  ;;  %1524 = vmatpush1.msra.mxu0 %v1471_v31  ;;  %v1010_v58 = vld [vmem:[#allocation2 + $0x4a] sm:$0xff]  ;;  %v1011_v3 = vld [vmem:[#allocation2 + $0x52] sm:$0xff] }
 0x541   :  { %1034 = vrot.lane.b32.xlu0 %v987_v61, %s2487_s30  ;;  %2095 = vmatprep.mubr.msk.f32.mxu1 %vm18_vm2, %v1006_v63  ;;  %v1467_v53 = vld [vmem:[%s3483_s1 + $0x188] sm:$0xff] }
 0x542   :  { %1525 = vmatprep.subr.mxu0 %v2483_v4  ;;  %v1463_v28 = vld [vmem:[%s3483_s1 + $0x168] sm:$0xff] }
 0x543   :  { %1526 = vmatpush1.msra.mxu0 %v1470_v9 }
 0x544   :  { %1256 = vmatmul.mubr.f32.gmra.mxu1 %v1126_v50  ;;  %1527 = vmatprep.subr.mxu0 %v2483_v4 }
 0x545   :  { %1098 = vrot.lane.b32.xlu0 %v1003_v10, %s2489_s23  ;;  %2096 = vmatprep.mubr.msk.f32.mxu1 %vm18_vm2, %v1007_v11  ;;  %v1469_v10 = vld [vmem:[%s3483_s1 + $0x198] sm:$0xff]  ;;  %v1468_v11 = vld [vmem:[%s3483_s1 + $0x190] sm:$0xff] }
 0x546   :  { %1528 = vmatpush1.msra.mxu0 %v1469_v10 }
 0x547   :  { %1529 = vmatprep.subr.mxu0 %v2483_v4 }
 0x548   :  { %1261 = vmatmul.mubr.f32.gmra.mxu1 %v1127_v55  ;;  %1530 = vmatpush1.msra.mxu0 %v1468_v11  ;;  %v1466_v55 = vld [vmem:[%s3483_s1 + $0x180] sm:$0xff] }
 0x549   :  { %2097 = vmatprep.mubr.msk.f32.mxu1 %vm18_vm2, %v1008_v5  ;;  %1531 = vmatprep.subr.mxu0 %v2483_v4  ;;  %v3107_v5 = vld [vmem:[%s3484_s2 + $0x1d8] ss:$0 sm:$0xff] }
 0x54a   :  { %1532 = vmatpush1.msra.mxu0 %v1467_v53 }
 0x54b   :  { %1533 = vmatprep.subr.mxu0 %v2483_v4 }
 0x54c   :  { %1534 = vmatpush1.msra.mxu0 %v1466_v55 }
 0x54d   :  { %1535 = vmatprep.subr.mxu0 %v2483_v4 }
 0x54e   :  { %1536 = vmatpush1.msra.mxu0 %v1465_v13 }
 0x54f   :  { %1537 = vmatprep.subr.mxu0 %v2483_v4 }
 0x550   :  { %1538 = vmatpush1.msra.mxu0 %v1464_v14 }
 0x551   :  { %1539 = vmatprep.subr.mxu0 %v2483_v4 }
 0x552   :  { %1540 = vmatpush1.msra.mxu0 %v1463_v28 }
 0x553   :  { %1541 = vmatprep.subr.mxu0 %v2483_v4 }
 0x5a2   :  { %v2402_v18 = vpop.permute.xlu1 %2401 }
 0x5a3   :  { %v2397_v17 = vpop.permute.xlu0 %2396  ;;  %v2403_v20 = vunpack.i.l.bf16 %v2402_v18  ;;  %v2404_v30 = vunpack.i.h.bf16 %v2402_v18  ;;  %v1462_v18 = vld [vmem:[%s3483_s1 + $0x160] sm:$0xff] }
 0x5a4   :  { %v2398_v19 = vunpack.i.l.bf16 %v2397_v17  ;;  %v2399_v32 = vunpack.i.h.bf16 %v2397_v17  ;;  %1542 = vmatpush1.msra.mxu0 %v1462_v18 }
 0x5a5   :  { %1567 = vmatprep.subr.mxu0 %v2483_v4 }
 0x5a6   :  { %v1112_v35 = vsel %vm18_vm2, %v976_v22, %v2398_v19  ;;  %v1113_v40 = vsel %vm18_vm2, %v977_v34, %v2399_v32  ;;  %v1481_v32 = vld [vmem:[%s3483_s1 + $0x1f8] sm:$0xff]  ;;  %v1478_v34 = vld [vmem:[%s3483_s1 + $0x1e0] sm:$0xff] }
 0x5a7   :  { %v1120_v33 = vsel %vm526_vm7, %v1112_v35, %v2403_v20  ;;  %v1121_v44 = vsel %vm526_vm7, %v1113_v40, %v2404_v30  ;;  %1568 = vmatpush2.msra.mxu0 %v1481_v32  ;;  %v1479_v30 = vld [vmem:[%s3483_s1 + $0x1e8] sm:$0xff] }
 0x5a8   :  { %v1033_v37 = vpop.permute.xlu1 %1032  ;;  %1569 = vmatprep.subr.mxu0 %v2483_v4 }
 0x5a9   :  { %v1114_v45 = vsel %vm18_vm2, %v978_v43, %v1033_v37 }
 0x5ab   :  { %v2407_v36 = vpop.permute.xlu0 %2406 }
 0x5ac   :  { %v2408_v29 = vunpack.i.l.bf16 %v2407_v36  ;;  %v2409_v38 = vunpack.i.h.bf16 %v2407_v36  ;;  %v1097_v46 = vpop.permute.xlu1 %1096  ;;  %v1480_v36 = vld [vmem:[%s3483_s1 + $0x1f0] sm:$0xff]  ;;  %s2492_s1 = smov 122  }
 0x5ad   :  { %1570 = vmatpush2.msra.mxu0 %v1480_v36 }
 0x5ae   :  { %v1128_v39 = vsel %vm552_vm8, %v1120_v33, %v2408_v29  ;;  %v1129_v48 = vsel %vm552_vm8, %v1121_v44, %v2409_v38  ;;  %1571 = vmatprep.subr.mxu0 %v2483_v4 }
 0x5af   :  { %v1065_v41 = vpop.permute.xlu0 %1064  ;;  %1266 = vmatmul.mubr.f32.gmra.mxu1 %v1128_v39  ;;  %1572 = vmatpush2.msra.mxu0 %v1479_v30 }
 0x5b0   :  { %2098 = vmatprep.mubr.msk.f32.mxu1 %vm18_vm2, %v1009_v42  ;;  %v1122_v51 = vsel %vm526_vm7, %v1114_v45, %v1065_v41  ;;  %v1067_v47 = vpop.permute.xlu1 %1066  ;;  %1573 = vmatprep.subr.mxu0 %v2483_v4 }
 0x5b1   :  { %v1130_v61 = vsel %vm552_vm8, %v1122_v51, %v1097_v46  ;;  %1574 = vmatpush2.msra.mxu0 %v1478_v34 }
 0x5b3   :  { %v1035_v54 = vpop.permute.xlu0 %1034  ;;  %1271 = vmatmul.mubr.f32.gmra.mxu1 %v1129_v48 }
 0x5b4   :  { %2099 = vmatprep.mubr.msk.f32.mxu1 %vm18_vm2, %v1010_v58  ;;  %v1115_v60 = vsel %vm18_vm2, %v979_v59, %v1035_v54 }
 0x5b5   :  { %v1123_v49 = vsel %vm526_vm7, %v1115_v60, %v1067_v47 }
 0x5b7   :  { %v1099_v63 = vpop.permute.xlu0 %1098  ;;  %1276 = vmatmul.mubr.f32.gmra.mxu1 %v1130_v61 }
 0x5b8   :  { %2100 = vmatprep.mubr.msk.f32.mxu1 %vm18_vm2, %v1011_v3  ;;  %v1131_v50 = vsel %vm552_vm8, %v1123_v49, %v1099_v63 }
 0x5bb   :  { %1281 = vmatmul.mubr.f32.gmra.mxu1 %v1131_v50 }
 0x5bc   :  { %1794 = vmatprep.mubr.f32.mxu1 %v2483_v4 }
 0x5fc   :  { %v1247_v56 = vpop.f32.mrf.mxu1 }
 0x5fd   :  { %v1248_v57 = vadd.f32 %v3107_v5, %v1247_v56 }
 0x5fe   :  { %v1249_v24 = vpop.f32.mrf.mxu1 }
 0x5ff   :  { %v1286_v17 = vmax.f32 %v1248_v57, 0.0 }
 0x600   :  { %v1252_v31 = vpop.f32.mrf.mxu1 }
 0x601   :  { %1294 = vst.msk [vmem:[#allocation2 + $0x8] sm:$0xff] %vm18_vm2, %v1286_v17  ;;  %v1253_v19 = vadd.f32 %v3107_v5, %v1252_v31 }
 0x602   :  { %v1254_v20 = vpop.f32.mrf.mxu1 }
 0x603   :  { %v1287_v22 = vmax.f32 %v1253_v19, 0.0 }
 0x604   :  { %v1257_v35 = vpop.f32.mrf.mxu1 }
 0x605   :  { %1295 = vst.msk [vmem:[#allocation2 + $0x10] sm:$0xff] %vm18_vm2, %v1287_v22  ;;  %v1258_v37 = vadd.f32 %v3107_v5, %v1257_v35 }
 0x606   :  { %v1259_v29 = vpop.f32.mrf.mxu1 }
 0x607   :  { %v1288_v33 = vmax.f32 %v1258_v37, 0.0 }
 0x608   :  { %v1262_v38 = vpop.f32.mrf.mxu1  ;;  %v1318_v42 = vld [vmem:[#allocation2 + $0x8] sm:$0xff] }
 0x609   :  { %1296 = vst.msk [vmem:[#allocation2 + $0x18] sm:$0xff] %vm18_vm2, %v1288_v33  ;;  %v1263_v39 = vadd.f32 %v3107_v5, %v1262_v38  ;;  %v1310_v43 = vld [vmem:[#allocation2 + $0x7] sm:$0xff] }
 0x60a   :  { %v1264_v40 = vpop.f32.mrf.mxu1 }
 0x60b   :  { %v1289_v41 = vmax.f32 %v1263_v39, 0.0 }
 0x60c   :  { %v1334_v44 = vld [vmem:[#allocation2 + $0xa] sm:$0xff] }
 0x60d   :  { %v1319_v45 = vld [vmem:[#allocation2 + $0x10] sm:$0xff]  ;;  %1297 = vst.msk [vmem:[#allocation2 + $0x20] sm:$0xff] %vm18_vm2, %v1289_v41  ;;  %2102 = vmatprep.mubr.msk.f32.mxu0 %vm18_vm2, %v1334_v44  ;;  %v1302_v41 = vld [vmem:[#allocation2 + $0x6] sm:$0xff] }
 0x60e   :  { %v1311_v46 = vld [vmem:[#allocation2 + $0xf] sm:$0xff]  ;;  %v2415_v48 = vpack.i.bf16 %v1319_v45, %v1318_v42 }
 0x60f   :  { %v2410_v51 = vpack.i.bf16 %v1311_v46, %v1310_v43  ;;  %v1326_v54 = vld [vmem:[#allocation2 + $0x9] sm:$0xff] }
 0x610   :  { %2416 = vrot.lane.b32.xlu0 %v2415_v48, %s2488_s5  ;;  %v1327_v58 = vld [vmem:[#allocation2 + $0x11] sm:$0xff] }
 0x611   :  { %2411 = vrot.lane.b32.xlu1 %v2410_v51, %s2487_s30  ;;  %v2420_v59 = vpack.i.bf16 %v1327_v58, %v1326_v54  ;;  %v1312_v60 = vld [vmem:[#allocation2 + $0x17] sm:$0xff] }
 0x612   :  { %v1320_v63 = vld [vmem:[#allocation2 + $0x18] sm:$0xff] }
 0x614   :  { %v1313_v61 = vld [vmem:[#allocation2 + $0x1f] sm:$0xff] }
 0x615   :  { %2421 = vrot.lane.b32.xlu1 %v2420_v59, %s2489_s23  ;;  %v1321_v3 = vld [vmem:[#allocation2 + $0x20] sm:$0xff]  ;;  %v2425_v47 = vpack.i.bf16 %v1313_v61, %v1312_v60  ;;  %v1303_v59 = vld [vmem:[#allocation2 + $0xe] sm:$0xff] }
 0x616   :  { %v2430_v49 = vpack.i.bf16 %v1321_v3, %v1320_v63  ;;  %v1328_v50 = vld [vmem:[#allocation2 + $0x19] sm:$0xff]  ;;  %v1329_v9 = vld [vmem:[#allocation2 + $0x21] sm:$0xff] }
 0x617   :  { %2426 = vrot.lane.b32.xlu0 %v2425_v47, %s2487_s30  ;;  %v2435_v10 = vpack.i.bf16 %v1329_v9, %v1328_v50 }
 0x619   :  { %2431 = vrot.lane.b32.xlu1 %v2430_v49, %s2488_s5 }
 0x61b   :  { %2436 = vrot.lane.b32.xlu0 %v2435_v10, %s2489_s23  ;;  %v1335_v10 = vld [vmem:[#allocation2 + $0x12] sm:$0xff] }
 0x66f   :  { %v1267_v11 = vpop.f32.mrf.mxu1 }
 0x670   :  { %v1268_v53 = vadd.f32 %v3107_v5, %v1267_v11 }
 0x671   :  { %v1269_v55 = vpop.f32.mrf.mxu1 }
 0x672   :  { %v1290_v13 = vmax.f32 %v1268_v53, 0.0  ;;  %v1304_v55 = vld [vmem:[#allocation2 + $0x16] sm:$0xff] }
 0x673   :  { %v1272_v56 = vpop.f32.mrf.mxu1 }
 0x674   :  { %1298 = vst.msk [vmem:[#allocation2 + $0x38] sm:$0xff] %vm18_vm2, %v1290_v13  ;;  %v1273_v57 = vadd.f32 %v3107_v5, %v1272_v56 }
 0x675   :  { %v1274_v14 = vpop.f32.mrf.mxu1 }
 0x676   :  { %v1291_v24 = vmax.f32 %v1273_v57, 0.0 }
 0x677   :  { %v1277_v17 = vpop.f32.mrf.mxu1 }
 0x678   :  { %1299 = vst.msk [vmem:[#allocation2 + $0x40] sm:$0xff] %vm18_vm2, %v1291_v24  ;;  %v1278_v28 = vadd.f32 %v3107_v5, %v1277_v17 }
 0x679   :  { %v1279_v31 = vpop.f32.mrf.mxu1 }
 0x67a   :  { %v1292_v18 = vmax.f32 %v1278_v28, 0.0  ;;  %v1336_v31 = vld [vmem:[#allocation2 + $0x1a] sm:$0xff] }
 0x67b   :  { %v1282_v19 = vpop.f32.mrf.mxu1  ;;  %v1322_v35 = vld [vmem:[#allocation2 + $0x38] sm:$0xff] }
 0x67c   :  { %1300 = vst.msk [vmem:[#allocation2 + $0x48] sm:$0xff] %vm18_vm2, %v1292_v18  ;;  %v1283_v20 = vadd.f32 %v3107_v5, %v1282_v19  ;;  %v1314_v37 = vld [vmem:[#allocation2 + $0x37] sm:$0xff] }
 0x67d   :  { %v1284_v22 = vpop.f32.mrf.mxu1 }
 0x67e   :  { %v1293_v32 = vmax.f32 %v1283_v20, 0.0  ;;  %v1305_v20 = vld [vmem:[#allocation2 + $0x1e] sm:$0xff] }
 0x67f   :  { %v1323_v36 = vld [vmem:[#allocation2 + $0x40] sm:$0xff] }
 0x680   :  { %v1315_v29 = vld [vmem:[#allocation2 + $0x3f] sm:$0xff]  ;;  %1301 = vst.msk [vmem:[#allocation2 + $0x50] sm:$0xff] %vm18_vm2, %v1293_v32  ;;  %v2445_v30 = vpack.i.bf16 %v1323_v36, %v1322_v35 }
 0x681   :  { %v2440_v33 = vpack.i.bf16 %v1315_v29, %v1314_v37  ;;  %v1330_v5 = vld [vmem:[#allocation2 + $0x39] sm:$0xff]  ;;  %v1337_v37 = vld [vmem:[#allocation2 + $0x22] sm:$0xff] }
 0x682   :  { %v2417_v34 = vpop.permute.xlu0 %2416  ;;  %2446 = vrot.lane.b32.xlu0 %v2445_v30, %s2488_s5 }
 0x683   :  { %v2412_v38 = vpop.permute.xlu1 %2411  ;;  %2441 = vrot.lane.b32.xlu1 %v2440_v33, %s2487_s30  ;;  %v2418_v40 = vunpack.i.l.bf16 %v2417_v34  ;;  %v1331_v42 = vld [vmem:[#allocation2 + $0x41] sm:$0xff]  ;;  %v2419_v54 = vunpack.i.h.bf16 %v2417_v34 }
 0x684   :  { %v2413_v39 = vunpack.i.l.bf16 %v2412_v38  ;;  %v2414_v43 = vunpack.i.h.bf16 %v2412_v38  ;;  %v2450_v45 = vpack.i.bf16 %v1331_v42, %v1330_v5  ;;  %v1316_v48 = vld [vmem:[#allocation2 + $0x47] sm:$0xff]  ;;  %v1338_v33 = vld [vmem:[#allocation2 + $0x3a] sm:$0xff] }
 0x685   :  { %v1324_v50 = vld [vmem:[#allocation2 + $0x48] sm:$0xff] }
 0x686   :  { %v1438_v44 = vsel %vm18_vm2, %v1302_v41, %v2413_v39  ;;  %1362 = vrot.lane.b32.xlu0 %v1316_v48, %s2487_s30  ;;  %v1439_v63 = vsel %vm18_vm2, %v1303_v59, %v2414_v43  ;;  %v1306_v41 = vld [vmem:[#allocation2 + $0x36] sm:$0xff] }
 0x687   :  { %v2422_v46 = vpop.permute.xlu1 %2421  ;;  %2451 = vrot.lane.b32.xlu1 %v2450_v45, %s2489_s23  ;;  %v1446_v58 = vsel %vm526_vm7, %v1438_v44, %v2418_v40  ;;  %v1332_v49 = vld [vmem:[#allocation2 + $0x49] sm:$0xff]  ;;  %v1447_v53 = vsel %vm526_vm7, %v1439_v63, %v2419_v54  ;;  %v1333_v36 = vld [vmem:[#allocation2 + $0x51] sm:$0xff] }
 0x688   :  { %v2423_v51 = vunpack.i.l.bf16 %v2422_v46  ;;  %v2424_v60 = vunpack.i.h.bf16 %v2422_v46  ;;  %v1325_v24 = vld [vmem:[#allocation2 + $0x50] sm:$0xff] }
 0x689   :  { %v2427_v3 = vpop.permute.xlu0 %2426  ;;  %v1317_v17 = vld [vmem:[#allocation2 + $0x4f] sm:$0xff] }
 0x68a   :  { %v1454_v61 = vsel %vm552_vm8, %v1446_v58, %v2423_v51  ;;  %v2428_v9 = vunpack.i.l.bf16 %v2427_v3  ;;  %1426 = vrot.lane.b32.xlu0 %v1332_v49, %s2489_s23  ;;  %v2429_v13 = vunpack.i.h.bf16 %v2427_v3  ;;  %v1455_v56 = vsel %vm552_vm8, %v1447_v53, %v2424_v60  ;;  %v1307_v51 = vld [vmem:[#allocation2 + $0x3e] sm:$0xff]  ;;  %v1308_v3 = vld [vmem:[#allocation2 + $0x46] sm:$0xff]  ;;  %v1309_v53 = vld [vmem:[#allocation2 + $0x4e] sm:$0xff] }
 0x68b   :  { %v2432_v47 = vpop.permute.xlu1 %2431  ;;  %1576 = vmatmul.mubr.f32.vlgmr.msra.gmra.mxu0 %v1454_v61  ;;  %1394 = vrot.lane.b32.xlu1 %v1324_v50, %s2488_s5  ;;  %v1339_v61 = vld [vmem:[#allocation2 + $0x42] sm:$0xff] }
 0x68c   :  { %v2433_v11 = vunpack.i.l.bf16 %v2432_v47  ;;  %2103 = vmatprep.mubr.msk.f32.mxu0 %vm18_vm2, %v1335_v10  ;;  %v1440_v57 = vsel %vm18_vm2, %v1304_v55, %v2428_v9  ;;  %v2434_v18 = vunpack.i.h.bf16 %v2432_v47  ;;  %v1441_v35 = vsel %vm18_vm2, %v1305_v20, %v2429_v13 }
 0x68d   :  { %v2437_v14 = vpop.permute.xlu0 %2436 }
 0x68e   :  { %v2438_v28 = vunpack.i.l.bf16 %v2437_v14  ;;  %1396 = vrot.lane.b32.xlu0 %v1325_v24, %s2488_s5  ;;  %v1448_v19 = vsel %vm526_vm7, %v1440_v57, %v2433_v11  ;;  %v2439_v22 = vunpack.i.h.bf16 %v2437_v14  ;;  %v1449_v29 = vsel %vm526_vm7, %v1441_v35, %v2434_v18  ;;  %v1340_v11 = vld [vmem:[#allocation2 + $0x4a] sm:$0xff]  ;;  %v1341_v14 = vld [vmem:[#allocation2 + $0x52] sm:$0xff]  ;;  %s2494_s5 = smov [#allocation3]  }
 0x68f   :  { %1581 = vmatmul.mubr.f32.gmra.mxu0 %v1455_v56  ;;  %1364 = vrot.lane.b32.xlu1 %v1317_v17, %s2487_s30 }
 0x690   :  { %2104 = vmatprep.mubr.msk.f32.mxu0 %vm18_vm2, %v1336_v31  ;;  %v1456_v32 = vsel %vm552_vm8, %v1448_v19, %v2438_v28  ;;  %v1457_v30 = vsel %vm552_vm8, %v1449_v29, %v2439_v22  ;;  %v3207_v28 = vld [vmem:[%s3484_s2 + $0x1e0] ss:$0 sm:$0xff] }
 0x693   :  { %1586 = vmatmul.mubr.f32.gmra.mxu0 %v1456_v32  ;;  %1428 = vrot.lane.b32.xlu1 %v1333_v36, %s2489_s23  ;;  %s2051_s23 = sshll.u32 %s2494_s5, 4  ;;  %s2052_s23 = int_to_ptr.vmem [resolvable:$true] %s2051_s23 }
 0x694   :  { %2105 = vmatprep.mubr.msk.f32.mxu0 %vm18_vm2, %v1337_v37  ;;  %s2461_s18 = scalar_lea.vmem %s2052_s23, 32  ;;  %p2466_p1 = scmp.lt.s32.totalorder %s2052_s23, %s2052_s23 }
 0x695   :  { %p2462_p0 = scmp.ne.s32.totalorder %s2052_s23, %s2461_s18  ;;  %p2467_p2 = scmp.lt.s32.totalorder %s2461_s18, %s2461_s18 }
 0x697   :  { %1591 = vmatmul.mubr.f32.gmra.mxu0 %v1457_v30  ;;  %p2468_p3 = por %p2467_p2, %p2466_p1 }
 0x698   :  { %2106 = vmatprep.mubr.msk.f32.mxu0 %vm18_vm2, %v1338_v33 }
 0x699   :  { %p2469_p4 = pnand %p2468_p3, %p2462_p0 }
 0x6f4   :  { %v2447_v34 = vpop.permute.xlu0 %2446 }
 0x6f5   :  { %v2442_v38 = vpop.permute.xlu1 %2441  ;;  %v2448_v40 = vunpack.i.l.bf16 %v2447_v34  ;;  %v2449_v46 = vunpack.i.h.bf16 %v2447_v34 }
 0x6f6   :  { %v2443_v39 = vunpack.i.l.bf16 %v2442_v38  ;;  %v2444_v5 = vunpack.i.h.bf16 %v2442_v38 }
 0x6f8   :  { %v1442_v42 = vsel %vm18_vm2, %v1306_v41, %v2443_v39  ;;  %v1363_v43 = vpop.permute.xlu0 %1362  ;;  %v1443_v59 = vsel %vm18_vm2, %v1307_v51, %v2444_v5 }
 0x6f9   :  { %v2452_v44 = vpop.permute.xlu1 %2451  ;;  %v1450_v48 = vsel %vm526_vm7, %v1442_v42, %v2448_v40  ;;  %v1451_v47 = vsel %vm526_vm7, %v1443_v59, %v2449_v46  ;;  %v1444_v49 = vsel %vm18_vm2, %v1308_v3, %v1363_v43  ;;  %v1708_v3 = vld [vmem:[%s3485_s3 + $0x50] sm:$0xff] }
 0x6fa   :  { %v2453_v45 = vunpack.i.l.bf16 %v2452_v44  ;;  %v2454_v54 = vunpack.i.h.bf16 %v2452_v44 }
 0x6fc   :  { %v1458_v58 = vsel %vm552_vm8, %v1450_v48, %v2453_v45  ;;  %v1427_v63 = vpop.permute.xlu0 %1426  ;;  %v1459_v50 = vsel %vm552_vm8, %v1451_v47, %v2454_v54  ;;  %v1707_v47 = vld [vmem:[%s3485_s3 + $0x48] sm:$0xff] }
 0x6fd   :  { %v1395_v60 = vpop.permute.xlu1 %1394  ;;  %1596 = vmatmul.mubr.f32.gmra.mxu0 %v1458_v58 }
 0x6fe   :  { %2107 = vmatprep.mubr.msk.f32.mxu0 %vm18_vm2, %v1339_v61  ;;  %v1452_v9 = vsel %vm526_vm7, %v1444_v49, %v1395_v60  ;;  %v1713_v60 = vld [vmem:[%s3485_s3 + $0x78] sm:$0xff]  ;;  %v1710_v61 = vld [vmem:[%s3485_s3 + $0x60] sm:$0xff] }
 0x6ff   :  { %v1460_v56 = vsel %vm552_vm8, %v1452_v9, %v1427_v63  ;;  %1746 = vmatprep.subr.mxu1 %v1713_v60  ;;  %v1709_v63 = vld [vmem:[%s3485_s3 + $0x58] sm:$0xff]  ;;  %v1706_v49 = vld [vmem:[%s3485_s3 + $0x40] sm:$0xff]  ;;  %v1704_v9 = vld [vmem:[%s3485_s3 + $0x30] sm:$0xff] }
 0x700   :  { %v1397_v55 = vpop.permute.xlu0 %1396  ;;  %1747 = vmatpush1.msra.mxu1 %v1712_v21 }
 0x701   :  { %v1365_v10 = vpop.permute.xlu1 %1364  ;;  %1601 = vmatmul.mubr.f32.gmra.mxu0 %v1459_v50  ;;  %v1705_v50 = vld [vmem:[%s3485_s3 + $0x38] sm:$0xff] }
 0x702   :  { %2108 = vmatprep.mubr.msk.f32.mxu0 %vm18_vm2, %v1340_v11  ;;  %v1445_v13 = vsel %vm18_vm2, %v1309_v53, %v1365_v10  ;;  %v1703_v10 = vld [vmem:[%s3485_s3 + $0x28] sm:$0xff]  ;;  %v1702_v11 = vld [vmem:[%s3485_s3 + $0x20] sm:$0xff]  ;;  %v1701_v53 = vld [vmem:[%s3485_s3 + $0x18] sm:$0xff] }
 0x703   :  { %v1453_v24 = vsel %vm526_vm7, %v1445_v13, %v1397_v55  ;;  %v1700_v55 = vld [vmem:[%s3485_s3 + $0x10] sm:$0xff]  ;;  %v1699_v13 = vld [vmem:[%s3485_s3 + $0x8] sm:$0xff] }
 0x705   :  { %v1429_v57 = vpop.permute.xlu1 %1428  ;;  %1606 = vmatmul.mubr.f32.gmra.mxu0 %v1460_v56  ;;  %v1698_v56 = vld [vmem:[%s3485_s3] sm:$0xff] }
 0x706   :  { %2109 = vmatprep.mubr.msk.f32.mxu0 %vm18_vm2, %v1341_v14  ;;  %v1461_v17 = vsel %vm552_vm8, %v1453_v24, %v1429_v57 }
 0x709   :  { %1611 = vmatmul.mubr.f32.gmra.mxu0 %v1461_v17 }
 0x74b   :  { %v1577_v31 = vpop.f32.mrf.mxu0 }
 0x74c   :  { %v1578_v18 = vadd.f32 %v3207_v28, %v1577_v31 }
 0x74d   :  { %v1579_v19 = vpop.f32.mrf.mxu0 }
 0x74e   :  { %v1616_v20 = vadd.f32 %v1578_v18, %v956_v27 }
 0x74f   :  { %v1582_v22 = vpop.f32.mrf.mxu0 }
 0x750   :  { %v1583_v32 = vadd.f32 %v3207_v28, %v1582_v22  ;;  %v1624_v36 = vmax.f32 %v1616_v20, 0.0 }
 0x751   :  { %v1584_v35 = vpop.f32.mrf.mxu0 }
 0x752   :  { %v1617_v37 = vadd.f32 %v1583_v32, %v957_v15  ;;  %v1658_v38 = vsel %vm18_vm2, %v1624_v36, 0.0  ;;  %v1632_v12 = vsel %vm18_vm2, %v1624_v36, -inf }
 0x753   :  { %v1587_v29 = vpop.f32.mrf.mxu0 }
 0x754   :  { %v1625_v30 = vmax.f32 %v1617_v37, 0.0  ;;  %v1588_v33 = vadd.f32 %v3207_v28, %v1587_v29 }
 0x755   :  { %v1589_v34 = vpop.f32.mrf.mxu0 }
 0x756   :  { %v1659_v39 = vsel %vm18_vm2, %v1625_v30, 0.0  ;;  %v1618_v16 = vadd.f32 %v1588_v33, %v958_v26  ;;  %v1633_v25 = vsel %vm18_vm2, %v1625_v30, -inf }
 0x757   :  { %v1660_v27 = vadd.f32 %v1659_v39, %v1658_v38  ;;  %v1592_v40 = vpop.f32.mrf.mxu0 }
 0x758   :  { %v1626_v41 = vmax.f32 %v1618_v16, 0.0  ;;  %v1593_v5 = vadd.f32 %v3207_v28, %v1592_v40 }
 0x759   :  { %v1594_v42 = vpop.f32.mrf.mxu0 }
 0x75a   :  { %v1634_v15 = vsel %vm18_vm2, %v1626_v41, -inf  ;;  %v1661_v43 = vsel %vm18_vm2, %v1626_v41, 0.0  ;;  %v1619_v44 = vadd.f32 %v1593_v5, %v959_v23  ;;  %v1711_v23 = vld [vmem:[%s3485_s3 + $0x68] sm:$0xff] }
 0x75b   :  { %v1635_v45 = vmax.f32 %v1632_v12, %v1634_v15  ;;  %v1662_v46 = vadd.f32 %v1661_v43, %v1660_v27  ;;  %1748 = vmatprep.subr.mxu1 %v1711_v23 }
 0x75c   :  { %v1627_v48 = vmax.f32 %v1619_v44, 0.0  ;;  %1749 = vmatpush1.msra.mxu1 %v1710_v61 }
 0x75d   :  { %1750 = vmatprep.subr.mxu1 %v1709_v63  ;;  %v1817_v63 = vld [vmem:[%s3484_s2 + $0x98] sm:$0xff] }
 0x75e   :  { %v1636_v26 = vsel %vm18_vm2, %v1627_v48, -inf  ;;  %v1663_v51 = vsel %vm18_vm2, %v1627_v48, 0.0  ;;  %1751 = vmatpush1.msra.mxu1 %v1708_v3  ;;  %v1832_v3 = vld [vmem:[%s3484_s2 + $0x110] sm:$0xff] }
 0x75f   :  { %v1637_v54 = vmax.f32 %v1633_v25, %v1636_v26  ;;  %v1664_v58 = vadd.f32 %v1663_v51, %v1662_v46  ;;  %1752 = vmatprep.subr.mxu1 %v1707_v47 }
 0x760   :  { %1753 = vmatpush1.msra.mxu1 %v1706_v49 }
 0x761   :  { %v3229_v59 = vmax.f32 %v1635_v45, %v1637_v54  ;;  %1754 = vmatprep.subr.mxu1 %v1705_v50  ;;  %v1665_v36 = vrot.slane %v1664_v58, 4  ;;  %v1834_v54 = vld [vmem:[%s3484_s2 + $0x120] sm:$0xff]  ;;  %v1816_v50 = vld [vmem:[%s3484_s2 + $0x90] sm:$0xff] }
 0x762   :  { %1755 = vmatpush1.msra.mxu1 %v1704_v9  ;;  %2170 = vmatprep.subr.mxu0 %v1834_v54  ;;  %v1831_v9 = vld [vmem:[%s3484_s2 + $0x108] sm:$0xff]  ;;  %v1717_v54 = vlaneseq }
 0x763   :  { %1756 = vmatprep.subr.mxu1 %v1703_v10  ;;  %v1666_v62 = vadd.f32 %v1665_v36, %v1664_v58  ;;  %v1818_v58 = vld [vmem:[%s3484_s2 + $0xa0] sm:$0xff] }
 0x764   :  { %1757 = vmatpush1.msra.mxu1 %v1702_v11  ;;  %2171 = vmatpush3.msra.mxu0 %v1818_v58  ;;  %v1718_v58 = vshrl.u32 %v1717_v54, 7 }
 0x765   :  { %1758 = vmatprep.subr.mxu1 %v1701_v53  ;;  %v1667_v42 = vrot.slane %v1666_v62, 2 }
 0x766   :  { %1759 = vmatpush1.msra.mxu1 %v1700_v55 }
 0x767   :  { %1760 = vmatprep.subr.mxu1 %v1699_v13  ;;  %v1668_v6 = vadd.f32 %v1667_v42, %v1666_v62  ;;  %v1815_v13 = vld [vmem:[%s3484_s2 + $0x88] sm:$0xff]  ;;  %v1808_v62 = vld [vmem:[%s3484_s2 + $0x50] sm:$0xff] }
 0x768   :  { %1761 = vmatpush1.msra.mxu1 %v1698_v56  ;;  %v1830_v56 = vld [vmem:[%s3484_s2 + $0x100] sm:$0xff]  ;;  %v1819_v42 = vld [vmem:[%s3484_s2 + $0xa8] sm:$0xff] }
 0x769   :  { %2318 = vmatprep.subr.mxu1 %v2483_v4  ;;  %v1669_v23 = vrot.slane %v1668_v6, 1 }
 0x76b   :  { %v1670_v10 = vadd.f32 %v1669_v23, %v1668_v6  ;;  %v1918_v6 = vld [vmem:[%s3484_s2 + $0x160] sm:$0xff] }
 0x7bd   :  { %v1597_v57 = vpop.f32.mrf.mxu0 }
 0x7be   :  { %v1598_v14 = vadd.f32 %v3207_v28, %v1597_v57 }
 0x7bf   :  { %v1599_v24 = vpop.f32.mrf.mxu0 }
 0x7c0   :  { %v1620_v18 = vadd.f32 %v1598_v14, %v960_v2  ;;  %v1639_v2 = vrot.slane %v3229_v59, 4  ;;  %v1814_v24 = vld [vmem:[%s3484_s2 + $0x80] sm:$0xff] }
 0x7c1   :  { %v1602_v17 = vpop.f32.mrf.mxu0 }
 0x7c2   :  { %v1603_v31 = vadd.f32 %v3207_v28, %v1602_v17  ;;  %v1628_v37 = vmax.f32 %v1620_v18, 0.0  ;;  %v1829_v17 = vld [vmem:[%s3484_s2 + $0xf8] sm:$0xff] }
 0x7c3   :  { %v1604_v19 = vpop.f32.mrf.mxu0 }
 0x7c4   :  { %v1621_v20 = vadd.f32 %v1603_v31, %v961_v0  ;;  %v1645_v0 = vsel %vm18_vm2, %v1628_v37, -inf  ;;  %v1671_v16 = vsel %vm18_vm2, %v1628_v37, 0.0  ;;  %v1684_v31 = vmul.f32 0.03125, %v1670_v10  ;;  %v1812_v37 = vld [vmem:[%s3484_s2 + $0x70] sm:$0xff]  ;;  %v1915_v10 = vld [vmem:[%s3484_s2 + $0x148] sm:$0xff] }
 0x7c5   :  { %v1607_v22 = vpop.f32.mrf.mxu0 }
 0x7c6   :  { %v1629_v32 = vmax.f32 %v1621_v20, 0.0  ;;  %v1608_v35 = vadd.f32 %v3207_v28, %v1607_v22  ;;  %v1813_v22 = vld [vmem:[%s3484_s2 + $0x78] sm:$0xff] }
 0x7c7   :  { %v1609_v29 = vpop.f32.mrf.mxu0 }
 0x7c8   :  { %v1622_v30 = vadd.f32 %v1608_v35, %v962_v8  ;;  %v1672_v34 = vsel %vm18_vm2, %v1629_v32, 0.0  ;;  %v1646_v15 = vsel %vm18_vm2, %v1629_v32, -inf  ;;  %v1828_v32 = vld [vmem:[%s3484_s2 + $0xf0] sm:$0xff]  ;;  %v1827_v29 = vld [vmem:[%s3484_s2 + $0xe8] sm:$0xff] }
 0x7c9   :  { %v1612_v33 = vpop.f32.mrf.mxu0  ;;  %v1673_v8 = vadd.f32 %v1672_v34, %v1671_v16  ;;  %v1810_v34 = vld [vmem:[%s3484_s2 + $0x60] sm:$0xff] }
 0x7ca   :  { %v1630_v38 = vmax.f32 %v1622_v30, 0.0  ;;  %v1613_v1 = vadd.f32 %v3207_v28, %v1612_v33  ;;  %v1640_v28 = vmax.f32 %v3229_v59, %v1639_v2  ;;  %v1833_v59 = vld [vmem:[%s3484_s2 + $0x118] sm:$0xff]  ;;  %v1811_v30 = vld [vmem:[%s3484_s2 + $0x68] sm:$0xff]  ;;  %v1826_v33 = vld [vmem:[%s3484_s2 + $0xe0] sm:$0xff] }
 0x7cb   :  { %v1614_v39 = vpop.f32.mrf.mxu0  ;;  %2172 = vmatprep.subr.mxu0 %v1833_v59  ;;  %v1824_v2 = vld [vmem:[%s3484_s2 + $0xd0] sm:$0xff]  ;;  %v1822_v16 = vld [vmem:[%s3484_s2 + $0xc0] sm:$0xff]  ;;  %v1719_v59 = vsub.s32 0, %v1718_v58 }
 0x7cc   :  { %v1647_v27 = vsel %vm18_vm2, %v1630_v38, -inf  ;;  %v1674_v40 = vsel %vm18_vm2, %v1630_v38, 0.0  ;;  %v1623_v7 = vadd.f32 %v1613_v1, %v963_v52  ;;  %v1641_v48 = vrot.slane %v1640_v28, 2  ;;  %2173 = vmatpush3.msra.mxu0 %v1817_v63  ;;  %v1825_v38 = vld [vmem:[%s3484_s2 + $0xd8] sm:$0xff]  ;;  %v1807_v39 = vld [vmem:[%s3484_s2 + $0x48] sm:$0xff] }
 0x7cd   :  { %v1648_v41 = vmax.f32 %v1645_v0, %v1647_v27  ;;  %v1675_v12 = vadd.f32 %v1674_v40, %v1673_v8  ;;  %2174 = vmatprep.subr.mxu0 %v1832_v3  ;;  %v1809_v1 = vld [vmem:[%s3484_s2 + $0x58] sm:$0xff]  ;;  %v1823_v0 = vld [vmem:[%s3484_s2 + $0xc8] sm:$0xff] }
 0x7ce   :  { %v1631_v5 = vmax.f32 %v1623_v7, 0.0  ;;  %v1642_v61 = vmax.f32 %v1640_v28, %v1641_v48  ;;  %2175 = vmatpush3.msra.mxu0 %v1816_v50  ;;  %v1806_v7 = vld [vmem:[%s3484_s2 + $0x40] sm:$0xff]  ;;  %v1821_v8 = vld [vmem:[%s3484_s2 + $0xb8] sm:$0xff]  ;;  %v1804_v28 = vld [vmem:[%s3484_s2 + $0x30] sm:$0xff] }
 0x7cf   :  { %2176 = vmatprep.subr.mxu0 %v1831_v9  ;;  %v1921_v48 = vld [vmem:[%s3484_s2 + $0x178] sm:$0xff] }
 0x7d0   :  { %v1649_v43 = vsel %vm18_vm2, %v1631_v5, -inf  ;;  %v1676_v44 = vsel %vm18_vm2, %v1631_v5, 0.0  ;;  %v1643_v55 = vrot.slane %v1642_v61, 1  ;;  %2177 = vmatpush3.msra.mxu0 %v1815_v13  ;;  %v1820_v5 = vld [vmem:[%s3484_s2 + $0xb0] sm:$0xff]  ;;  %v1911_v13 = vld [vmem:[%s3484_s2 + $0x128] sm:$0xff] }
 0x7d1   :  { %v1650_v45 = vmax.f32 %v1646_v15, %v1649_v43  ;;  %v1677_v46 = vadd.f32 %v1676_v44, %v1675_v12  ;;  %2178 = vmatprep.subr.mxu0 %v1830_v56  ;;  %v1803_v12 = vld [vmem:[%s3484_s2 + $0x28] sm:$0xff]  ;;  %v1926_v15 = vld [vmem:[%s3484_s2 + $0x1a0] sm:$0xff]  ;;  %v1925_v43 = vld [vmem:[%s3484_s2 + $0x198] sm:$0xff] }
 0x7d2   :  { %v1644_v20 = vmax.f32 %v1642_v61, %v1643_v55  ;;  %2179 = vmatpush3.msra.mxu0 %v1814_v24  ;;  %v1924_v44 = vld [vmem:[%s3484_s2 + $0x190] sm:$0xff]  ;;  %v2114_v56 = vld [vmem:[%s3484_s2 + $0x1b8] ss:$0 sm:$0xff] }
 0x7d3   :  { %v1651_v25 = vmax.f32 %v1648_v41, %v1650_v45  ;;  %v1678_v26 = vrot.slane %v1677_v46, 4  ;;  %2180 = vmatprep.subr.mxu0 %v1829_v17  ;;  %v1805_v41 = vld [vmem:[%s3484_s2 + $0x38] sm:$0xff]  ;;  %v1923_v45 = vld [vmem:[%s3484_s2 + $0x188] sm:$0xff]  ;;  %v1912_v55 = vld [vmem:[%s3484_s2 + $0x130] sm:$0xff]  ;;  %2022 = vrot.lane.b32.xlu1 %v2114_v56, %s2491_s13 }
 0x7d4   :  { %2181 = vmatpush3.msra.mxu0 %v1813_v22 }
 0x7d5   :  { %v1652_v52 = vrot.slane %v1651_v25, 4  ;;  %v1679_v51 = vadd.f32 %v1678_v26, %v1677_v46  ;;  %2182 = vmatprep.subr.mxu0 %v1828_v32  ;;  %v1922_v46 = vld [vmem:[%s3484_s2 + $0x180] sm:$0xff]  ;;  %v1919_v26 = vld [vmem:[%s3484_s2 + $0x168] sm:$0xff] }
 0x7d6   :  { %2183 = vmatpush3.msra.mxu0 %v1812_v37 }
 0x7d7   :  { %v1653_v60 = vmax.f32 %v1651_v25, %v1652_v52  ;;  %v1680_v21 = vrot.slane %v1679_v51, 2  ;;  %2184 = vmatprep.subr.mxu0 %v1827_v29  ;;  %v1920_v25 = vld [vmem:[%s3484_s2 + $0x170] sm:$0xff]  ;;  %v1917_v52 = vld [vmem:[%s3484_s2 + $0x158] sm:$0xff] }
 0x7d8   :  { %2185 = vmatpush3.msra.mxu0 %v1811_v30 }
 0x7d9   :  { %v1654_v47 = vrot.slane %v1653_v60, 2  ;;  %v1681_v49 = vadd.f32 %v1680_v21, %v1679_v51  ;;  %2186 = vmatprep.subr.mxu0 %v1826_v33  ;;  %v1916_v51 = vld [vmem:[%s3484_s2 + $0x150] sm:$0xff]  ;;  %v1723_v21 = vsub.s32 1, %v1718_v58 }
 0x7da   :  { %2187 = vmatpush3.msra.mxu0 %v1810_v34 }
 0x7db   :  { %v1682_v11 = vrot.slane %v1681_v49, 1  ;;  %v1655_v53 = vmax.f32 %v1653_v60, %v1654_v47  ;;  %2188 = vmatprep.subr.mxu0 %v1825_v38  ;;  %v2110_v60 = vld [vmem:[%s3485_s3 + $0x80] ss:$8 sm:$0x3] }
 0x7dc   :  { %2189 = vmatpush3.msra.mxu0 %v1809_v1  ;;  %v1720_v23 = vrot.slane %v2110_v60, %v1719_v59  ;;  %v1724_v61 = vrot.slane %v2110_v60, %v1723_v21 }
 0x7dd   :  { %v1683_v57 = vadd.f32 %v1682_v11, %v1681_v49  ;;  %v1656_v14 = vrot.slane %v1655_v53, 1  ;;  %2190 = vmatprep.subr.mxu0 %v1824_v2  ;;  %v1914_v11 = vld [vmem:[%s3484_s2 + $0x140] sm:$0xff] }
 0x7de   :  { %2191 = vmatpush3.msra.mxu0 %v1808_v62 }
 0x7df   :  { %v1685_v18 = vmul.f32 0.03125, %v1683_v57  ;;  %v1657_v19 = vmax.f32 %v1655_v53, %v1656_v14  ;;  %2192 = vmatprep.subr.mxu0 %v1823_v0  ;;  %v1913_v53 = vld [vmem:[%s3484_s2 + $0x138] sm:$0xff]  ;;  %v2112_v14 = vld [vmem:[%s3484_s2 + $0x1b0] ss:$0 sm:$0xff] }
 0x7e0   :  { %2193 = vmatpush3.msra.mxu0 %v1807_v39 }
 0x7e1   :  { %v1693_v35 = vsel %vm1688_vm9, %v1685_v18, %v1684_v31  ;;  %v1689_v36 = vsel %vm1688_vm9, %v1657_v19, %v1644_v20  ;;  %2194 = vmatprep.subr.mxu0 %v1822_v16 }
 0x7e2   :  { %1694 = vrot.lane.b32.xlu0 %v1693_v35, %s2487_s30  ;;  %2195 = vmatpush3.msra.mxu0 %v1806_v7 }
 0x7e3   :  { %2196 = vmatprep.subr.mxu0 %v1821_v8 }
 0x7e4   :  { %2197 = vmatpush3.msra.mxu0 %v1805_v41 }
 0x7e5   :  { %2198 = vmatprep.subr.mxu0 %v1820_v5 }
 0x7e6   :  { %2199 = vmatpush3.msra.mxu0 %v1804_v28 }
 0x7e7   :  { %2200 = vmatprep.subr.mxu0 %v1819_v42 }
 0x7e8   :  { %2201 = vmatpush3.msra.mxu0 %v1803_v12 }
 0x845   :  { %v2023_v32 = vpop.permute.xlu1 %2022 }
 0x854   :  { %v1695_v27 = vpop.permute.xlu0 %1694 }
 0x855   :  { %v1697_v40 = vsel %vm18_vm2, %v1689_v36, %v1695_v27 }
 0x856   :  { %2111 = vmatmul.mubr.msk.f32.vlgmr.msra.gmra.mxu1 %vm526_vm7, %v1697_v40 }
 0x857   :  { %2319 = vmatpush3.msra.mxu1 %v1926_v15  ;;  %2350 = vmatprep.mubr.msk.f32.mxu1 %vm2490_vm10, %v2483_v4 }
 0x858   :  { %2320 = vmatprep.subr.mxu1 %v2483_v4 }
 0x859   :  { %2321 = vmatpush3.msra.mxu1 %v1925_v43 }
 0x85a   :  { %2322 = vmatprep.subr.mxu1 %v2483_v4 }
 0x85b   :  { %2323 = vmatpush3.msra.mxu1 %v1924_v44 }
 0x85c   :  { %2324 = vmatprep.subr.mxu1 %v2483_v4 }
 0x85d   :  { %2325 = vmatpush3.msra.mxu1 %v1923_v45 }
 0x85e   :  { %2326 = vmatprep.subr.mxu1 %v2483_v4 }
 0x85f   :  { %2327 = vmatpush3.msra.mxu1 %v1922_v46 }
 0x860   :  { %2328 = vmatprep.subr.mxu1 %v2483_v4 }
 0x861   :  { %2329 = vmatpush3.msra.mxu1 %v1921_v48 }
 0x862   :  { %2330 = vmatprep.subr.mxu1 %v2483_v4 }
 0x863   :  { %2331 = vmatpush3.msra.mxu1 %v1920_v25 }
 0x864   :  { %2332 = vmatprep.subr.mxu1 %v2483_v4 }
 0x865   :  { %2333 = vmatpush3.msra.mxu1 %v1919_v26 }
 0x866   :  { %2334 = vmatprep.subr.mxu1 %v2483_v4 }
 0x867   :  { %2335 = vmatpush3.msra.mxu1 %v1918_v6 }
 0x868   :  { %2336 = vmatprep.subr.mxu1 %v2483_v4 }
 0x869   :  { %2337 = vmatpush3.msra.mxu1 %v1917_v52 }
 0x86a   :  { %2338 = vmatprep.subr.mxu1 %v2483_v4 }
 0x86b   :  { %2339 = vmatpush3.msra.mxu1 %v1916_v51 }
 0x86c   :  { %2340 = vmatprep.subr.mxu1 %v2483_v4 }
 0x86d   :  { %2341 = vmatpush3.msra.mxu1 %v1915_v10 }
 0x86e   :  { %2342 = vmatprep.subr.mxu1 %v2483_v4 }
 0x86f   :  { %2343 = vmatpush3.msra.mxu1 %v1914_v11 }
 0x870   :  { %2344 = vmatprep.subr.mxu1 %v2483_v4 }
 0x871   :  { %2345 = vmatpush3.msra.mxu1 %v1913_v53 }
 0x872   :  { %2346 = vmatprep.subr.mxu1 %v2483_v4 }
 0x873   :  { %2347 = vmatpush3.msra.mxu1 %v1912_v55 }
 0x874   :  { %2348 = vmatprep.subr.mxu1 %v2483_v4  ;;  %v2113_v4 = vld [vmem:[%s3484_s2 + $0x1a8] ss:$0 sm:$0xff]  ;;  %s2493_s2 = smov 102  }
 0x875   :  { %2349 = vmatpush3.msra.mxu1 %v1911_v13 }
 0x916   :  { %v1796_v63 = vpop.f32.mrf.mxu1 }
 0x917   :  { %v1797_v3 = vadd.f32 %v1796_v63, %v1720_v23 }
 0x918   :  { %v1798_v47 = vpop.f32.mrf.mxu1 }
 0x919   :  { %v1799_v49 = vadd.f32 %v1798_v47, %v1724_v61  ;;  %v1801_v9 = vmax.f32 %v1797_v3, 0.0 }
 0x91b   :  { %v1802_v50 = vmax.f32 %v1799_v49, 0.0 }
 0x91d   :  { %1904 = vmatprep.mubr.f32.mxu0 %v1802_v50 }
 0x91e   :  { %1905 = vmatmul.mubr.f32.vlgmr.msra.gmra.mxu0 %v1801_v9 }
 0x9de   :  { %v2202_v57 = vpop.f32.mrf.mxu0 }
 0x9e0   :  { %v2203_v24 = vpop.f32.mrf.mxu0 }
 0x9e1   :  { %v2204_v17 = vadd.f32 %v2203_v24, %v2202_v57 }
 0x9e3   :  { %v1907_v31 = vadd.f32 %v2204_v17, %v2112_v14 }
 0x9e5   :  { %v1910_v18 = vmax.f32 %v1907_v31, 0.0 }
 0x9e7   :  { %2351 = vmatmul.mubr.f32.vlgmr.msra.gmra.mxu1 %v1910_v18 }
 0xaa7   :  { %v1998_v19 = vpop.f32.mrf.mxu1 }
 0xaa8   :  { %v1999_v20 = vadd.f32 %v2113_v4, %v1998_v19 }
 0xaa9   :  { %v2352_v22 = vpop.f32.mrf.mxu1 }
 0xaaa   :  { %v2015_v35 = vmax.f32 %v1999_v20, 0.0  ;;  %v2003_v36 = vsel %vm2002_vm11, %v1999_v20, -inf }
 0xaab   :  { %2004 = vmax.xlane.f32.xlu1 %v2003_v36 }
 0xaac   :  { %v2025_v37 = vmul.f32 %v2023_v32, %v2015_v35 }
 0xaae   :  { %2027 = vrot.lane.b32.xlu0 %v2025_v37, %s2492_s1 }
 0xb20   :  { %v2028_v29 = vpop.permute.xlu0 %2027 }
 0xb21   :  { %v2031_v30 = vsel %vm2030_vm12, %v2028_v29, 0.0 }
 0xb22   :  { %2032 = vadd.xlane.f32.xlu0 %v2031_v30 }
 0xb34   :  { %v2005_v33 = vpop.xlane.xlu1 %2004 }
 0xb35   :  { %v2006_v34 = vsub.f32 %v1999_v20, %v2005_v33 }
 0xb37   :  { %v2007_v38 = vmul.f32 1.442695, %v2006_v34 }
 0xb39   :  { %2455 = vpow2.f32 %v2007_v38 }
 0xb46   :  { %v2456_v1 = vpop.eup %2455 }
 0xb47   :  { %v2009_v2 = vsel %vm2002_vm11, %v2456_v1, 0.0 }
 0xb48   :  { %2010 = vadd.xlane.f32.xlu0 %v2009_v2 }
 0xbab   :  { %v2033_v62 = vpop.xlane.xlu0 %2032 }
 0xbac   :  { %v2034_v0 = vadd.f32 %v2114_v56, %v2033_v62 }
 0xbae   :  { %2457 = vtanh.f32 %v2034_v0 }
 0xbbb   :  { %v2458_v39 = vpop.eup %2457 }
 0xbbc   :  { %2037 = vrot.lane.b32.xlu1 %v2458_v39, %s2493_s2 }
 0xbd1   :  { %v2011_v16 = vpop.xlane.xlu0 %2010 }
 0xbd2   :  { %2459 = vlog2.f32 %v2011_v16 }
 0xbdf   :  { %v2460_v27 = vpop.eup %2459 }
 0xbe0   :  { %v2013_v40 = vmul.f32 0.6931472, %v2460_v27 }
 0xbe2   :  { %v2014_v7 = vsub.f32 %v2006_v34, %v2013_v40 }
 0xc2e   :  { %v2038_v8 = vpop.permute.xlu1 %2037 }
 0xc2f   :  { %v2041_v41 = vsel %vm2040_vm13, %v2014_v7, %v2038_v8 }
 0xc30   :  { %v2043_v5 = vsel %vm2042_vm14, %v2041_v41, 0.0 }
 0xc31   :  { %2044 = vst [vmem:[#allocation3] sm:$0x3] %v2043_v5 }
 0xc32   :  { %2472 = shalt.err (!%p2469_p4)
}
 0xc33   :  { %2054 = dma.vmem_to_hbm [thread:$0]  %s2052_s23, 32, %s3486_s4, [#allocation4]  }
 0xc34   :  { %2481 = dma.done.wait [#allocation4], 32  }
 0xc35   :  { %2482 = vsyncadd [#allocation4], 4294967264 }
 0xc36   :  { %2058 = vsyncpa [#allocation4], 1 }

</bundles_post_ra>
